<compile_context>
chip_gen: v7x
topology: tpu7x:2x2x1
jax: 0.10.0
libtpu: 0.0.40
codegen_flags: <defaults>
</compile_context>

<pallas_src>
import functools

import jax
import jax.numpy as jnp
from jax.experimental import pallas as pl
from jax.experimental.pallas import tpu as pltpu


def _erf(x):
    # Abramowitz & Stegun 7.1.26 (max abs err ~1.5e-7): float32-accurate and
    # uses only ops guaranteed to lower in Mosaic (exp / mul / add / where).
    p = 0.3275911
    a1, a2, a3, a4, a5 = (0.254829592, -0.284496736, 1.421413741,
                          -1.453152027, 1.061405429)
    s = jnp.where(x >= 0.0, 1.0, -1.0)
    ax = jnp.abs(x)
    t = 1.0 / (1.0 + p * ax)
    poly = ((((a5 * t + a4) * t + a3) * t + a2) * t + a1) * t
    return s * (1.0 - poly * jnp.exp(-ax * ax))


def _gelu(x):
    # exact (erf-based) GELU, matching torch.nn.GELU() default
    return 0.5 * x * (1.0 + _erf(x * 0.7071067811865476))


def _sigmoid(x):
    return 1.0 / (1.0 + jnp.exp(-x))


def _shift(v, d, hw):
    """s[p] = v[p + d] cyclically along the flattened H*W lane axis.

    Wrap-around entries are garbage; the caller zeroes them with the border
    masks.  Shift amount normalized to [0, hw)."""
    return pltpu.roll(v, (-d) % hw, axis=1)


def hc_ra_kernel(W, x_ref, inv_mnum_ref, tmask_ref, w0_ref, gamma_ref,
                 beta_ref, w1_ref, b1_ref, dw_ref, w2_ref, b2_ref, o_ref):
    C, HW = x_ref.shape
    eps = 1e-5
    inv_hw = 1.0 / float(HW)
    inv_n = 1.0 / float(HW * C)

    x = x_ref[...]                                   # (C, HW) f32

    tmask = tmask_ref[...]                           # (9, HW) {0,1} f32
    # Rows of tmask correspond to 3x3 taps (kh*3+kw); tap (kh,kw) is valid at
    # destination pixel p iff the neighbour (h+kh-1, w+kw-1) is in-bounds.
    mh0 = tmask[1:2, :]   # h != 0    -> h-1 neighbour valid
    mw0 = tmask[3:4, :]   # w != 0    -> w-1 valid
    mw1 = tmask[5:6, :]   # w != W-1  -> w+1 valid
    mh1 = tmask[7:8, :]   # h != H-1  -> h+1 valid

    # ---- 3x3 box-sum == AvgPool2d(3,1,1,count_include_pad=True) * 9 --------
    # Separable: lane rolls (XLU) + border masks; no padded scratch buffers.
    row = x + _shift(x, -1, HW) * mw0 + _shift(x, +1, HW) * mw1
    box = row + _shift(row, -W, HW) * mh0 + _shift(row, +W, HW) * mh1
    second_der = (box - x) * inv_mnum_ref[...] - x   # (C, HW)

    # ---- channel gate: sigmoid(W0 @ GAP(x)) ---------------------------------
    # One lane-dense MXU matmul (M=C, K=C, N=HW) followed by a lane reduce;
    # mathematically identical to W0 @ mean_{hw}(x).
    wx = jnp.dot(w0_ref[...], x, preferred_element_type=jnp.float32)  # (C,HW)
    alpha = _sigmoid(jnp.sum(wx, axis=1, keepdims=True) * inv_hw)     # (C, 1)
    x1 = x + alpha * second_der                      # residual #1

    # ---- GroupNorm(num_groups=1): normalize over all C*H*W per sample ------
    mu = jnp.sum(jnp.sum(x1, axis=1, keepdims=True),
                 axis=0, keepdims=True) * inv_n                       # (1, 1)
    d = x1 - mu
    var = jnp.sum(jnp.sum(d * d, axis=1, keepdims=True),
                  axis=0, keepdims=True) * inv_n                      # (1, 1)
    scale = jax.lax.rsqrt(var + eps) * gamma_ref[...]                 # (C, 1)
    xn = d * scale + beta_ref[...]

    # ---- MLP: 1x1 conv -> GELU -> depthwise 3x3 -> 1x1 conv -----------------
    h = jnp.dot(w1_ref[...], xn,
                preferred_element_type=jnp.float32) + b1_ref[...]     # (hid,HW)
    h = _gelu(h)

    dw = dw_ref[...]                                 # (hidden, 9)
    acc = h * dw[:, 4:5]                             # centre tap (kh=1, kw=1)
    for kh in range(3):
        for kw in range(3):
            if kh == 1 and kw == 1:
                continue
            ti = kh * 3 + kw
            t = _shift(h, (kh - 1) * W + (kw - 1), HW)
            acc = acc + (t * tmask[ti:ti + 1, :]) * dw[:, ti:ti + 1]

    y = jnp.dot(w2_ref[...], acc,
                preferred_element_type=jnp.float32) + b2_ref[...]     # (C, HW)

    o_ref[...] = x1 + y                              # residual #2


def hc_ra_block(x_nchw, params):
    """HcRaBlock forward.  Input/output are NCHW (like the PyTorch module)."""
    B, C, H, W = x_nchw.shape
    HW = H * W
    hidden = params["w1"].shape[0]

    # NCHW -> (B, C, H*W): a contiguous reshape, no transpose / HBM shuffle.
    x = x_nchw.reshape(B, C, HW).astype(jnp.float32)

    # 1 / mean_num, lane-dense (multiply in kernel instead of divide).
    inv_mnum = (1.0 / params["mean_num"].astype(jnp.float32)).reshape(1, HW)

    # Per-tap border masks for the zero-padded 3x3 windows, host-precomputed.
    # Row kh*3+kw is 1 where the neighbour at offset (kh-1, kw-1) exists.
    hh = jnp.repeat(jnp.arange(H), W)
    ww = jnp.tile(jnp.arange(W), H)
    mh = [hh != 0, jnp.ones((HW,), bool), hh != H - 1]
    mw = [ww != 0, jnp.ones((HW,), bool), ww != W - 1]
    tap_masks = jnp.stack([mh[kh] & mw[kw]
                           for kh in range(3)
                           for kw in range(3)]).astype(jnp.float32)   # (9, HW)

    w0 = params["w0"].astype(jnp.float32)                     # (C, C)
    gamma = params["gamma"].reshape(C, 1).astype(jnp.float32)
    beta = params["beta"].reshape(C, 1).astype(jnp.float32)
    w1 = params["w1"].astype(jnp.float32)                     # (hidden, C)
    b1 = params["b1"].reshape(hidden, 1).astype(jnp.float32)
    dww = params["dww"].reshape(hidden, 9).astype(jnp.float32)
    w2 = params["w2"].astype(jnp.float32)                     # (C, hidden)
    b2 = params["b2"].reshape(C, 1).astype(jnp.float32)

    kernel = functools.partial(hc_ra_kernel, W)

    out = pl.pallas_call(
        kernel,
        out_shape=jax.ShapeDtypeStruct((B, C, HW), jnp.float32),
        grid_spec=pltpu.PrefetchScalarGridSpec(
            num_scalar_prefetch=0,
            grid=(B,),
            in_specs=[
                pl.BlockSpec((None, C, HW), lambda b: (b, 0, 0)),   # x
                pl.BlockSpec((1, HW), lambda b: (0, 0)),            # 1/mean_num
                pl.BlockSpec((9, HW), lambda b: (0, 0)),            # tap masks
                pl.BlockSpec((C, C), lambda b: (0, 0)),             # w0
                pl.BlockSpec((C, 1), lambda b: (0, 0)),             # gamma
                pl.BlockSpec((C, 1), lambda b: (0, 0)),             # beta
                pl.BlockSpec((hidden, C), lambda b: (0, 0)),        # w1
                pl.BlockSpec((hidden, 1), lambda b: (0, 0)),        # b1
                pl.BlockSpec((hidden, 9), lambda b: (0, 0)),        # dw weights
                pl.BlockSpec((C, hidden), lambda b: (0, 0)),        # w2
                pl.BlockSpec((C, 1), lambda b: (0, 0)),             # b2
            ],
            out_specs=pl.BlockSpec((None, C, HW), lambda b: (b, 0, 0)),
        ),
        compiler_params=pltpu.CompilerParams(
            dimension_semantics=("parallel",)),   # batch shards across v7x TCs
    )(x, inv_mnum, tap_masks, w0, gamma, beta, w1, b1, dww, w2, b2)

    return out.reshape(B, C, H, W)


def ref_hc_ra_block(x_nchw, params):
    """Plain-JAX reference (same math, NHWC), for correctness checking."""
    x = jnp.transpose(x_nchw, (0, 2, 3, 1)).astype(jnp.float32)
    B, H, W, C = x.shape
    mnum = params["mean_num"][None]                              # (1, H, W, 1)

    padx = jnp.pad(x, ((0, 0), (1, 1), (1, 1), (0, 0)))
    box = sum(padx[:, kh:kh + H, kw:kw + W, :]
              for kh in range(3) for kw in range(3))
    second_der = (box - x) / mnum - x

    gap = jnp.mean(x, axis=(1, 2))                               # (B, C)
    alpha = _sigmoid(gap @ params["w0"].T)
    x1 = x + alpha[:, None, None, :] * second_der

    mu = jnp.mean(x1, axis=(1, 2, 3), keepdims=True)
    var = jnp.mean((x1 - mu) ** 2, axis=(1, 2, 3), keepdims=True)
    xn = (x1 - mu) * jax.lax.rsqrt(var + 1e-5)
    xn = xn * params["gamma"] + params["beta"]

    h = _gelu(xn @ params["w1"].T + params["b1"])
    padh = jnp.pad(h, ((0, 0), (1, 1), (1, 1), (0, 0)))
    acc = sum(padh[:, kh:kh + H, kw:kw + W, :] * params["dww"][:, kh, kw]
              for kh in range(3) for kw in range(3))
    y = acc @ params["w2"].T + params["b2"]
    out = x1 + y
    return jnp.transpose(out, (0, 3, 1, 2))


if __name__ == "__main__":
    B, C, H, W = 2, 8, 16, 16           # dim=8, input_resolution=(16,16)
    mlp_ratio = 4.0
    hidden = int(C * mlp_ratio)

    key = jax.random.PRNGKey(0)
    kx, k0, k1, k2, k3 = jax.random.split(key, 5)

    def trunc_normal(k, shape, std=0.02):
        return std * jax.random.truncated_normal(k, -2.0, 2.0, shape, jnp.float32)

    # mean_num buffer: (3x3 zero-padded box count) - 1 at each pixel.
    ones = jnp.ones((H, W), jnp.float32)
    pones = jnp.pad(ones, 1)
    cnt = sum(pones[kh:kh + H, kw:kw + W] for kh in range(3) for kw in range(3))
    mean_num = (cnt - 1.0)[:, :, None]                           # (H, W, 1)

    params = {
        "mean_num": mean_num,
        "w0": trunc_normal(k0, (C, C)),            # fc_0 (1x1 conv, no bias)
        "gamma": jnp.ones((C,), jnp.float32),      # GroupNorm affine (default)
        "beta": jnp.zeros((C,), jnp.float32),
        "w1": trunc_normal(k1, (hidden, C)),       # mlp.fc1 weight
        "b1": jnp.zeros((hidden,), jnp.float32),   # mlp.fc1 bias (init 0)
        "dww": trunc_normal(k2, (hidden, 3, 3)),   # mlp.dwconv depthwise weight
        "w2": trunc_normal(k3, (C, hidden)),       # mlp.fc2 weight
        "b2": jnp.zeros((C,), jnp.float32),        # mlp.fc2 bias (init 0)
    }
    # TODO(synk): Dropout / DropPath are identity here (drop=0, drop_path=0),
    # matching the module defaults, so they are omitted.

    x = jax.random.normal(kx, (B, C, H, W), jnp.float32)

    out = jax.jit(hc_ra_block)(x, params)
    out = jax.block_until_ready(out)

    ref = ref_hc_ra_block(x, params)
    assert out.shape == (B, C, H, W)
    assert bool(jnp.allclose(out, ref, rtol=2e-3, atol=2e-3)), (
        "max abs diff: %g" % float(jnp.max(jnp.abs(out - ref))))

    print("KERNEL_OK")
</pallas_src>

<mosaic_0001>
module attributes {stable_mosaic.version = 11 : i64} {
  func.func @hc_ra_kernel(%arg0: i32, %arg1: memref<1x8x256xf32, #tpu.memory_space<vmem>>, %arg2: memref<1x256xf32, #tpu.memory_space<vmem>>, %arg3: memref<9x256xf32, #tpu.memory_space<vmem>>, %arg4: memref<8x8xf32, #tpu.memory_space<vmem>>, %arg5: memref<8x1xf32, #tpu.memory_space<vmem>>, %arg6: memref<8x1xf32, #tpu.memory_space<vmem>>, %arg7: memref<32x8xf32, #tpu.memory_space<vmem>>, %arg8: memref<32x1xf32, #tpu.memory_space<vmem>>, %arg9: memref<32x9xf32, #tpu.memory_space<vmem>>, %arg10: memref<8x32xf32, #tpu.memory_space<vmem>>, %arg11: memref<8x1xf32, #tpu.memory_space<vmem>>, %arg12: memref<1x8x256xf32, #tpu.memory_space<vmem>>) attributes {dimension_semantics = [#tpu.dimension_semantics<parallel>], iteration_bounds = array<i64: 2>, scalar_prefetch = 0 : i64, scratch_operands = 0 : i64, tpu.core_type = #tpu.core_type<tc>, window_params = [{transform_indices = @transform_0, window_bounds = array<i64: 1, 8, 256>}, {pipeline_mode = #tpu.pipeline_mode<synchronous>, transform_indices = @transform_1, window_bounds = array<i64: 1, 256>}, {pipeline_mode = #tpu.pipeline_mode<synchronous>, transform_indices = @transform_2, window_bounds = array<i64: 9, 256>}, {pipeline_mode = #tpu.pipeline_mode<synchronous>, transform_indices = @transform_3, window_bounds = array<i64: 8, 8>}, {pipeline_mode = #tpu.pipeline_mode<synchronous>, transform_indices = @transform_4, window_bounds = array<i64: 8, 1>}, {pipeline_mode = #tpu.pipeline_mode<synchronous>, transform_indices = @transform_5, window_bounds = array<i64: 8, 1>}, {pipeline_mode = #tpu.pipeline_mode<synchronous>, transform_indices = @transform_6, window_bounds = array<i64: 32, 8>}, {pipeline_mode = #tpu.pipeline_mode<synchronous>, transform_indices = @transform_7, window_bounds = array<i64: 32, 1>}, {pipeline_mode = #tpu.pipeline_mode<synchronous>, transform_indices = @transform_8, window_bounds = array<i64: 32, 9>}, {pipeline_mode = #tpu.pipeline_mode<synchronous>, transform_indices = @transform_9, window_bounds = array<i64: 8, 32>}, {pipeline_mode = #tpu.pipeline_mode<synchronous>, transform_indices = @transform_10, window_bounds = array<i64: 8, 1>}, {transform_indices = @transform_11, window_bounds = array<i64: 1, 8, 256>}]} {
    %c0 = arith.constant 0 : index
    %c0_0 = arith.constant 0 : index
    %c0_1 = arith.constant 0 : index
    %0 = vector.load %arg1[%c0, %c0_0, %c0_1] : memref<1x8x256xf32, #tpu.memory_space<vmem>>, vector<1x8x256xf32>
    %1 = vector.shape_cast %0 : vector<1x8x256xf32> to vector<8x256xf32>
    %c0_2 = arith.constant 0 : index
    %c0_3 = arith.constant 0 : index
    %2 = vector.load %arg3[%c0_2, %c0_3] : memref<9x256xf32, #tpu.memory_space<vmem>>, vector<9x256xf32>
    %3 = vector.extract_strided_slice %2 {offsets = [1, 0], sizes = [1, 256], strides = [1, 1]} : vector<9x256xf32> to vector<1x256xf32>
    %4 = vector.extract_strided_slice %2 {offsets = [3, 0], sizes = [1, 256], strides = [1, 1]} : vector<9x256xf32> to vector<1x256xf32>
    %5 = vector.extract_strided_slice %2 {offsets = [5, 0], sizes = [1, 256], strides = [1, 1]} : vector<9x256xf32> to vector<1x256xf32>
    %6 = vector.extract_strided_slice %2 {offsets = [7, 0], sizes = [1, 256], strides = [1, 1]} : vector<9x256xf32> to vector<1x256xf32>
    %c1_i32 = arith.constant 1 : i32
    %7 = tpu.dynamic_rotate %1 by %c1_i32 dim 1 : vector<8x256xf32>, i32 -> vector<8x256xf32>
    %8 = vector.broadcast %4 : vector<1x256xf32> to vector<8x256xf32>
    %9 = arith.mulf %7, %8 : vector<8x256xf32>
    %10 = arith.addf %1, %9 : vector<8x256xf32>
    %c255_i32 = arith.constant 255 : i32
    %11 = tpu.dynamic_rotate %1 by %c255_i32 dim 1 : vector<8x256xf32>, i32 -> vector<8x256xf32>
    %12 = vector.broadcast %5 : vector<1x256xf32> to vector<8x256xf32>
    %13 = arith.mulf %11, %12 : vector<8x256xf32>
    %14 = arith.addf %10, %13 : vector<8x256xf32>
    %c16_i32 = arith.constant 16 : i32
    %15 = tpu.dynamic_rotate %14 by %c16_i32 dim 1 : vector<8x256xf32>, i32 -> vector<8x256xf32>
    %16 = vector.broadcast %3 : vector<1x256xf32> to vector<8x256xf32>
    %17 = arith.mulf %15, %16 : vector<8x256xf32>
    %18 = arith.addf %14, %17 : vector<8x256xf32>
    %c240_i32 = arith.constant 240 : i32
    %19 = tpu.dynamic_rotate %14 by %c240_i32 dim 1 : vector<8x256xf32>, i32 -> vector<8x256xf32>
    %20 = vector.broadcast %6 : vector<1x256xf32> to vector<8x256xf32>
    %21 = arith.mulf %19, %20 : vector<8x256xf32>
    %22 = arith.addf %18, %21 : vector<8x256xf32>
    %23 = arith.subf %22, %1 : vector<8x256xf32>
    %c0_4 = arith.constant 0 : index
    %c0_5 = arith.constant 0 : index
    %24 = vector.load %arg2[%c0_4, %c0_5] : memref<1x256xf32, #tpu.memory_space<vmem>>, vector<1x256xf32>
    %25 = vector.broadcast %24 : vector<1x256xf32> to vector<8x256xf32>
    %26 = arith.mulf %23, %25 : vector<8x256xf32>
    %27 = arith.subf %26, %1 : vector<8x256xf32>
    %c0_6 = arith.constant 0 : index
    %c0_7 = arith.constant 0 : index
    %28 = vector.load %arg4[%c0_6, %c0_7] : memref<8x8xf32, #tpu.memory_space<vmem>>, vector<8x8xf32>
    %cst = arith.constant dense<0.000000e+00> : vector<8x256xf32>
    %29 = tpu.matmul %28, %1, %cst {dimension_numbers = #tpu.dot_dimension_numbers<[1], [0], [0], [1], [0, 0, 1, 1], [], []>} : vector<8x8xf32>, vector<8x256xf32>, vector<8x256xf32> -> vector<8x256xf32>
    %cst_8 = arith.constant dense<0.000000e+00> : vector<8xf32>
    %30 = vector.multi_reduction <add>, %29, %cst_8 [1] : vector<8x256xf32> to vector<8xf32>
    %31 = vector.shape_cast %30 : vector<8xf32> to vector<8x1xf32>
    %cst_9 = arith.constant 3.906250e-03 : f32
    %32 = vector.broadcast %cst_9 : f32 to vector<8x1xf32>
    %33 = arith.mulf %31, %32 : vector<8x1xf32>
    %cst_10 = arith.constant 0.000000e+00 : f32
    %34 = vector.broadcast %cst_10 : f32 to vector<8x1xf32>
    %35 = arith.subf %34, %33 : vector<8x1xf32>
    %36 = math.exp %35 : vector<8x1xf32>
    %cst_11 = arith.constant 1.000000e+00 : f32
    %37 = vector.broadcast %cst_11 : f32 to vector<8x1xf32>
    %38 = arith.addf %37, %36 : vector<8x1xf32>
    %cst_12 = arith.constant 1.000000e+00 : f32
    %39 = vector.broadcast %cst_12 : f32 to vector<8x1xf32>
    %40 = arith.divf %39, %38 : vector<8x1xf32>
    %41 = vector.broadcast %40 : vector<8x1xf32> to vector<8x256xf32>
    %42 = arith.mulf %41, %27 : vector<8x256xf32>
    %43 = arith.addf %1, %42 : vector<8x256xf32>
    %cst_13 = arith.constant dense<0.000000e+00> : vector<8xf32>
    %44 = vector.multi_reduction <add>, %43, %cst_13 [1] : vector<8x256xf32> to vector<8xf32>
    %45 = vector.shape_cast %44 : vector<8xf32> to vector<8x1xf32>
    %cst_14 = arith.constant dense<0.000000e+00> : vector<1xf32>
    %46 = vector.multi_reduction <add>, %45, %cst_14 [0] : vector<8x1xf32> to vector<1xf32>
    %47 = vector.shape_cast %46 : vector<1xf32> to vector<1x1xf32>
    %cst_15 = arith.constant 4.8828125E-4 : f32
    %48 = vector.broadcast %cst_15 : f32 to vector<1x1xf32>
    %49 = arith.mulf %47, %48 : vector<1x1xf32>
    %50 = vector.broadcast %49 : vector<1x1xf32> to vector<8x256xf32>
    %51 = arith.subf %43, %50 : vector<8x256xf32>
    %52 = arith.mulf %51, %51 : vector<8x256xf32>
    %cst_16 = arith.constant dense<0.000000e+00> : vector<8xf32>
    %53 = vector.multi_reduction <add>, %52, %cst_16 [1] : vector<8x256xf32> to vector<8xf32>
    %54 = vector.shape_cast %53 : vector<8xf32> to vector<8x1xf32>
    %cst_17 = arith.constant dense<0.000000e+00> : vector<1xf32>
    %55 = vector.multi_reduction <add>, %54, %cst_17 [0] : vector<8x1xf32> to vector<1xf32>
    %56 = vector.shape_cast %55 : vector<1xf32> to vector<1x1xf32>
    %cst_18 = arith.constant 4.8828125E-4 : f32
    %57 = vector.broadcast %cst_18 : f32 to vector<1x1xf32>
    %58 = arith.mulf %56, %57 : vector<1x1xf32>
    %cst_19 = arith.constant 9.99999974E-6 : f32
    %59 = vector.broadcast %cst_19 : f32 to vector<1x1xf32>
    %60 = arith.addf %58, %59 : vector<1x1xf32>
    %61 = math.rsqrt %60 : vector<1x1xf32>
    %c0_20 = arith.constant 0 : index
    %c0_21 = arith.constant 0 : index
    %62 = vector.load %arg5[%c0_20, %c0_21] : memref<8x1xf32, #tpu.memory_space<vmem>>, vector<8x1xf32>
    %63 = vector.broadcast %61 : vector<1x1xf32> to vector<8x1xf32>
    %64 = arith.mulf %63, %62 : vector<8x1xf32>
    %65 = vector.broadcast %64 : vector<8x1xf32> to vector<8x256xf32>
    %66 = arith.mulf %51, %65 : vector<8x256xf32>
    %c0_22 = arith.constant 0 : index
    %c0_23 = arith.constant 0 : index
    %67 = vector.load %arg6[%c0_22, %c0_23] : memref<8x1xf32, #tpu.memory_space<vmem>>, vector<8x1xf32>
    %68 = vector.broadcast %67 : vector<8x1xf32> to vector<8x256xf32>
    %69 = arith.addf %66, %68 : vector<8x256xf32>
    %c0_24 = arith.constant 0 : index
    %c0_25 = arith.constant 0 : index
    %70 = vector.load %arg7[%c0_24, %c0_25] : memref<32x8xf32, #tpu.memory_space<vmem>>, vector<32x8xf32>
    %cst_26 = arith.constant dense<0.000000e+00> : vector<32x256xf32>
    %71 = tpu.matmul %70, %69, %cst_26 {dimension_numbers = #tpu.dot_dimension_numbers<[1], [0], [0], [1], [0, 0, 1, 1], [], []>} : vector<32x8xf32>, vector<8x256xf32>, vector<32x256xf32> -> vector<32x256xf32>
    %c0_27 = arith.constant 0 : index
    %c0_28 = arith.constant 0 : index
    %72 = vector.load %arg8[%c0_27, %c0_28] : memref<32x1xf32, #tpu.memory_space<vmem>>, vector<32x1xf32>
    %73 = vector.broadcast %72 : vector<32x1xf32> to vector<32x256xf32>
    %74 = arith.addf %71, %73 : vector<32x256xf32>
    %cst_29 = arith.constant 5.000000e-01 : f32
    %75 = vector.broadcast %cst_29 : f32 to vector<32x256xf32>
    %76 = arith.mulf %75, %74 : vector<32x256xf32>
    %cst_30 = arith.constant 0.707106769 : f32
    %77 = vector.broadcast %cst_30 : f32 to vector<32x256xf32>
    %78 = arith.mulf %74, %77 : vector<32x256xf32>
    %cst_31 = arith.constant 0.000000e+00 : f32
    %79 = vector.broadcast %cst_31 : f32 to vector<32x256xf32>
    %80 = arith.cmpf oge, %78, %79 : vector<32x256xf32>
    %cst_32 = arith.constant 1.000000e+00 : f32
    %cst_33 = arith.constant -1.000000e+00 : f32
    %81 = vector.broadcast %cst_32 : f32 to vector<32x256xf32>
    %82 = vector.broadcast %cst_33 : f32 to vector<32x256xf32>
    %83 = arith.select %80, %81, %82 : vector<32x256xi1>, vector<32x256xf32>
    %84 = math.absf %78 : vector<32x256xf32>
    %cst_34 = arith.constant 0.327591091 : f32
    %85 = vector.broadcast %cst_34 : f32 to vector<32x256xf32>
    %86 = arith.mulf %85, %84 : vector<32x256xf32>
    %cst_35 = arith.constant 1.000000e+00 : f32
    %87 = vector.broadcast %cst_35 : f32 to vector<32x256xf32>
    %88 = arith.addf %87, %86 : vector<32x256xf32>
    %cst_36 = arith.constant 1.000000e+00 : f32
    %89 = vector.broadcast %cst_36 : f32 to vector<32x256xf32>
    %90 = arith.divf %89, %88 : vector<32x256xf32>
    %cst_37 = arith.constant 1.06140542 : f32
    %91 = vector.broadcast %cst_37 : f32 to vector<32x256xf32>
    %92 = arith.mulf %91, %90 : vector<32x256xf32>
    %cst_38 = arith.constant -1.45315206 : f32
    %93 = vector.broadcast %cst_38 : f32 to vector<32x256xf32>
    %94 = arith.addf %92, %93 : vector<32x256xf32>
    %95 = arith.mulf %94, %90 : vector<32x256xf32>
    %cst_39 = arith.constant 1.42141378 : f32
    %96 = vector.broadcast %cst_39 : f32 to vector<32x256xf32>
    %97 = arith.addf %95, %96 : vector<32x256xf32>
    %98 = arith.mulf %97, %90 : vector<32x256xf32>
    %cst_40 = arith.constant -0.284496725 : f32
    %99 = vector.broadcast %cst_40 : f32 to vector<32x256xf32>
    %100 = arith.addf %98, %99 : vector<32x256xf32>
    %101 = arith.mulf %100, %90 : vector<32x256xf32>
    %cst_41 = arith.constant 0.254829586 : f32
    %102 = vector.broadcast %cst_41 : f32 to vector<32x256xf32>
    %103 = arith.addf %101, %102 : vector<32x256xf32>
    %104 = arith.mulf %103, %90 : vector<32x256xf32>
    %cst_42 = arith.constant 0.000000e+00 : f32
    %105 = vector.broadcast %cst_42 : f32 to vector<32x256xf32>
    %106 = arith.subf %105, %84 : vector<32x256xf32>
    %107 = arith.mulf %106, %84 : vector<32x256xf32>
    %108 = math.exp %107 : vector<32x256xf32>
    %109 = arith.mulf %104, %108 : vector<32x256xf32>
    %cst_43 = arith.constant 1.000000e+00 : f32
    %110 = vector.broadcast %cst_43 : f32 to vector<32x256xf32>
    %111 = arith.subf %110, %109 : vector<32x256xf32>
    %112 = arith.mulf %83, %111 : vector<32x256xf32>
    %cst_44 = arith.constant 1.000000e+00 : f32
    %113 = vector.broadcast %cst_44 : f32 to vector<32x256xf32>
    %114 = arith.addf %113, %112 : vector<32x256xf32>
    %115 = arith.mulf %76, %114 : vector<32x256xf32>
    %c0_45 = arith.constant 0 : index
    %c0_46 = arith.constant 0 : index
    %116 = vector.load %arg9[%c0_45, %c0_46] : memref<32x9xf32, #tpu.memory_space<vmem>>, vector<32x9xf32>
    %117 = vector.extract_strided_slice %116 {offsets = [0, 4], sizes = [32, 1], strides = [1, 1]} : vector<32x9xf32> to vector<32x1xf32>
    %118 = vector.broadcast %117 : vector<32x1xf32> to vector<32x256xf32>
    %119 = arith.mulf %115, %118 : vector<32x256xf32>
    %c17_i32 = arith.constant 17 : i32
    %120 = tpu.dynamic_rotate %115 by %c17_i32 dim 1 : vector<32x256xf32>, i32 -> vector<32x256xf32>
    %121 = vector.extract_strided_slice %2 {offsets = [0, 0], sizes = [1, 256], strides = [1, 1]} : vector<9x256xf32> to vector<1x256xf32>
    %122 = vector.broadcast %121 : vector<1x256xf32> to vector<32x256xf32>
    %123 = arith.mulf %120, %122 : vector<32x256xf32>
    %124 = vector.extract_strided_slice %116 {offsets = [0, 0], sizes = [32, 1], strides = [1, 1]} : vector<32x9xf32> to vector<32x1xf32>
    %125 = vector.broadcast %124 : vector<32x1xf32> to vector<32x256xf32>
    %126 = arith.mulf %123, %125 : vector<32x256xf32>
    %127 = arith.addf %119, %126 : vector<32x256xf32>
    %c16_i32_47 = arith.constant 16 : i32
    %128 = tpu.dynamic_rotate %115 by %c16_i32_47 dim 1 : vector<32x256xf32>, i32 -> vector<32x256xf32>
    %129 = vector.extract_strided_slice %2 {offsets = [1, 0], sizes = [1, 256], strides = [1, 1]} : vector<9x256xf32> to vector<1x256xf32>
    %130 = vector.broadcast %129 : vector<1x256xf32> to vector<32x256xf32>
    %131 = arith.mulf %128, %130 : vector<32x256xf32>
    %132 = vector.extract_strided_slice %116 {offsets = [0, 1], sizes = [32, 1], strides = [1, 1]} : vector<32x9xf32> to vector<32x1xf32>
    %133 = vector.broadcast %132 : vector<32x1xf32> to vector<32x256xf32>
    %134 = arith.mulf %131, %133 : vector<32x256xf32>
    %135 = arith.addf %127, %134 : vector<32x256xf32>
    %c15_i32 = arith.constant 15 : i32
    %136 = tpu.dynamic_rotate %115 by %c15_i32 dim 1 : vector<32x256xf32>, i32 -> vector<32x256xf32>
    %137 = vector.extract_strided_slice %2 {offsets = [2, 0], sizes = [1, 256], strides = [1, 1]} : vector<9x256xf32> to vector<1x256xf32>
    %138 = vector.broadcast %137 : vector<1x256xf32> to vector<32x256xf32>
    %139 = arith.mulf %136, %138 : vector<32x256xf32>
    %140 = vector.extract_strided_slice %116 {offsets = [0, 2], sizes = [32, 1], strides = [1, 1]} : vector<32x9xf32> to vector<32x1xf32>
    %141 = vector.broadcast %140 : vector<32x1xf32> to vector<32x256xf32>
    %142 = arith.mulf %139, %141 : vector<32x256xf32>
    %143 = arith.addf %135, %142 : vector<32x256xf32>
    %c1_i32_48 = arith.constant 1 : i32
    %144 = tpu.dynamic_rotate %115 by %c1_i32_48 dim 1 : vector<32x256xf32>, i32 -> vector<32x256xf32>
    %145 = vector.extract_strided_slice %2 {offsets = [3, 0], sizes = [1, 256], strides = [1, 1]} : vector<9x256xf32> to vector<1x256xf32>
    %146 = vector.broadcast %145 : vector<1x256xf32> to vector<32x256xf32>
    %147 = arith.mulf %144, %146 : vector<32x256xf32>
    %148 = vector.extract_strided_slice %116 {offsets = [0, 3], sizes = [32, 1], strides = [1, 1]} : vector<32x9xf32> to vector<32x1xf32>
    %149 = vector.broadcast %148 : vector<32x1xf32> to vector<32x256xf32>
    %150 = arith.mulf %147, %149 : vector<32x256xf32>
    %151 = arith.addf %143, %150 : vector<32x256xf32>
    %c255_i32_49 = arith.constant 255 : i32
    %152 = tpu.dynamic_rotate %115 by %c255_i32_49 dim 1 : vector<32x256xf32>, i32 -> vector<32x256xf32>
    %153 = vector.extract_strided_slice %2 {offsets = [5, 0], sizes = [1, 256], strides = [1, 1]} : vector<9x256xf32> to vector<1x256xf32>
    %154 = vector.broadcast %153 : vector<1x256xf32> to vector<32x256xf32>
    %155 = arith.mulf %152, %154 : vector<32x256xf32>
    %156 = vector.extract_strided_slice %116 {offsets = [0, 5], sizes = [32, 1], strides = [1, 1]} : vector<32x9xf32> to vector<32x1xf32>
    %157 = vector.broadcast %156 : vector<32x1xf32> to vector<32x256xf32>
    %158 = arith.mulf %155, %157 : vector<32x256xf32>
    %159 = arith.addf %151, %158 : vector<32x256xf32>
    %c241_i32 = arith.constant 241 : i32
    %160 = tpu.dynamic_rotate %115 by %c241_i32 dim 1 : vector<32x256xf32>, i32 -> vector<32x256xf32>
    %161 = vector.extract_strided_slice %2 {offsets = [6, 0], sizes = [1, 256], strides = [1, 1]} : vector<9x256xf32> to vector<1x256xf32>
    %162 = vector.broadcast %161 : vector<1x256xf32> to vector<32x256xf32>
    %163 = arith.mulf %160, %162 : vector<32x256xf32>
    %164 = vector.extract_strided_slice %116 {offsets = [0, 6], sizes = [32, 1], strides = [1, 1]} : vector<32x9xf32> to vector<32x1xf32>
    %165 = vector.broadcast %164 : vector<32x1xf32> to vector<32x256xf32>
    %166 = arith.mulf %163, %165 : vector<32x256xf32>
    %167 = arith.addf %159, %166 : vector<32x256xf32>
    %c240_i32_50 = arith.constant 240 : i32
    %168 = tpu.dynamic_rotate %115 by %c240_i32_50 dim 1 : vector<32x256xf32>, i32 -> vector<32x256xf32>
    %169 = vector.extract_strided_slice %2 {offsets = [7, 0], sizes = [1, 256], strides = [1, 1]} : vector<9x256xf32> to vector<1x256xf32>
    %170 = vector.broadcast %169 : vector<1x256xf32> to vector<32x256xf32>
    %171 = arith.mulf %168, %170 : vector<32x256xf32>
    %172 = vector.extract_strided_slice %116 {offsets = [0, 7], sizes = [32, 1], strides = [1, 1]} : vector<32x9xf32> to vector<32x1xf32>
    %173 = vector.broadcast %172 : vector<32x1xf32> to vector<32x256xf32>
    %174 = arith.mulf %171, %173 : vector<32x256xf32>
    %175 = arith.addf %167, %174 : vector<32x256xf32>
    %c239_i32 = arith.constant 239 : i32
    %176 = tpu.dynamic_rotate %115 by %c239_i32 dim 1 : vector<32x256xf32>, i32 -> vector<32x256xf32>
    %177 = vector.extract_strided_slice %2 {offsets = [8, 0], sizes = [1, 256], strides = [1, 1]} : vector<9x256xf32> to vector<1x256xf32>
    %178 = vector.broadcast %177 : vector<1x256xf32> to vector<32x256xf32>
    %179 = arith.mulf %176, %178 : vector<32x256xf32>
    %180 = vector.extract_strided_slice %116 {offsets = [0, 8], sizes = [32, 1], strides = [1, 1]} : vector<32x9xf32> to vector<32x1xf32>
    %181 = vector.broadcast %180 : vector<32x1xf32> to vector<32x256xf32>
    %182 = arith.mulf %179, %181 : vector<32x256xf32>
    %183 = arith.addf %175, %182 : vector<32x256xf32>
    %c0_51 = arith.constant 0 : index
    %c0_52 = arith.constant 0 : index
    %184 = vector.load %arg10[%c0_51, %c0_52] : memref<8x32xf32, #tpu.memory_space<vmem>>, vector<8x32xf32>
    %cst_53 = arith.constant dense<0.000000e+00> : vector<8x256xf32>
    %185 = tpu.matmul %184, %183, %cst_53 {dimension_numbers = #tpu.dot_dimension_numbers<[1], [0], [0], [1], [0, 0, 1, 1], [], []>} : vector<8x32xf32>, vector<32x256xf32>, vector<8x256xf32> -> vector<8x256xf32>
    %c0_54 = arith.constant 0 : index
    %c0_55 = arith.constant 0 : index
    %186 = vector.load %arg11[%c0_54, %c0_55] : memref<8x1xf32, #tpu.memory_space<vmem>>, vector<8x1xf32>
    %187 = vector.broadcast %186 : vector<8x1xf32> to vector<8x256xf32>
    %188 = arith.addf %185, %187 : vector<8x256xf32>
    %189 = arith.addf %43, %188 : vector<8x256xf32>
    %c0_56 = arith.constant 0 : index
    %c0_57 = arith.constant 0 : index
    %c0_58 = arith.constant 0 : index
    %190 = vector.load %arg12[%c0_56, %c0_57, %c0_58] : memref<1x8x256xf32, #tpu.memory_space<vmem>>, vector<1x8x256xf32>
    %191 = vector.shape_cast %190 : vector<1x8x256xf32> to vector<8x256xf32>
    %192 = vector.shape_cast %189 : vector<8x256xf32> to vector<1x8x256xf32>
    tpu.vector_store %arg12[%c0_56, %c0_57, %c0_58], %192 {strides = array<i32>} : memref<1x8x256xf32, #tpu.memory_space<vmem>>, vector<1x8x256xf32>,
    return
  }
  func.func @transform_0(%arg0: i32) -> (i32, i32, i32) {
    %c0_i32 = arith.constant 0 : i32
    %c0_i32_0 = arith.constant 0 : i32
    %c0_i32_1 = arith.constant 0 : i32
    return %arg0, %c0_i32, %c0_i32_0 : i32, i32, i32
  }
  func.func @transform_1(%arg0: i32) -> (i32, i32) {
    %c0_i32 = arith.constant 0 : i32
    %c0_i32_0 = arith.constant 0 : i32
    %c0_i32_1 = arith.constant 0 : i32
    return %c0_i32, %c0_i32_0 : i32, i32
  }
  func.func @transform_2(%arg0: i32) -> (i32, i32) {
    %c0_i32 = arith.constant 0 : i32
    %c0_i32_0 = arith.constant 0 : i32
    %c0_i32_1 = arith.constant 0 : i32
    return %c0_i32, %c0_i32_0 : i32, i32
  }
  func.func @transform_3(%arg0: i32) -> (i32, i32) {
    %c0_i32 = arith.constant 0 : i32
    %c0_i32_0 = arith.constant 0 : i32
    %c0_i32_1 = arith.constant 0 : i32
    return %c0_i32, %c0_i32_0 : i32, i32
  }
  func.func @transform_4(%arg0: i32) -> (i32, i32) {
    %c0_i32 = arith.constant 0 : i32
    %c0_i32_0 = arith.constant 0 : i32
    %c0_i32_1 = arith.constant 0 : i32
    return %c0_i32, %c0_i32_0 : i32, i32
  }
  func.func @transform_5(%arg0: i32) -> (i32, i32) {
    %c0_i32 = arith.constant 0 : i32
    %c0_i32_0 = arith.constant 0 : i32
    %c0_i32_1 = arith.constant 0 : i32
    return %c0_i32, %c0_i32_0 : i32, i32
  }
  func.func @transform_6(%arg0: i32) -> (i32, i32) {
    %c0_i32 = arith.constant 0 : i32
    %c0_i32_0 = arith.constant 0 : i32
    %c0_i32_1 = arith.constant 0 : i32
    return %c0_i32, %c0_i32_0 : i32, i32
  }
  func.func @transform_7(%arg0: i32) -> (i32, i32) {
    %c0_i32 = arith.constant 0 : i32
    %c0_i32_0 = arith.constant 0 : i32
    %c0_i32_1 = arith.constant 0 : i32
    return %c0_i32, %c0_i32_0 : i32, i32
  }
  func.func @transform_8(%arg0: i32) -> (i32, i32) {
    %c0_i32 = arith.constant 0 : i32
    %c0_i32_0 = arith.constant 0 : i32
    %c0_i32_1 = arith.constant 0 : i32
    return %c0_i32, %c0_i32_0 : i32, i32
  }
  func.func @transform_9(%arg0: i32) -> (i32, i32) {
    %c0_i32 = arith.constant 0 : i32
    %c0_i32_0 = arith.constant 0 : i32
    %c0_i32_1 = arith.constant 0 : i32
    return %c0_i32, %c0_i32_0 : i32, i32
  }
  func.func @transform_10(%arg0: i32) -> (i32, i32) {
    %c0_i32 = arith.constant 0 : i32
    %c0_i32_0 = arith.constant 0 : i32
    %c0_i32_1 = arith.constant 0 : i32
    return %c0_i32, %c0_i32_0 : i32, i32
  }
  func.func @transform_11(%arg0: i32) -> (i32, i32, i32) {
    %c0_i32 = arith.constant 0 : i32
    %c0_i32_0 = arith.constant 0 : i32
    %c0_i32_1 = arith.constant 0 : i32
    return %arg0, %c0_i32, %c0_i32_0 : i32, i32, i32
  }
}

</mosaic_0001>

<bundles_post_ra>
// kernel: hc_ra_block.1
= control target key start
LH: loop header
LB: loop body
LE: loop exit
PB: predicated region body
PF: predicated region fallthrough
CT: control target
= control target key end

     0   :  { %s1900_s17 = smov 0   ;;  %s2897_s0 = inlined_call_operand.vmem [shape: f32[2,8,256], index: 0, kind: input, shape index: {}]   ;;  %s2898_s1 = inlined_call_operand.vmem [shape: f32[1,256], index: 1, kind: input, shape index: {}]   ;;  %s2899_s2 = inlined_call_operand.vmem [shape: f32[9,256], index: 2, kind: input, shape index: {}]   ;;  %s2900_s3 = inlined_call_operand.vmem [shape: f32[8,8], index: 3, kind: input, shape index: {}]   ;;  %s2901_s4 = inlined_call_operand.vmem [shape: f32[8,1], index: 4, kind: input, shape index: {}]   ;;  %s2902_s5 = inlined_call_operand.vmem [shape: f32[8,1], index: 5, kind: input, shape index: {}]   ;;  %s2903_s6 = inlined_call_operand.vmem [shape: f32[32,8], index: 6, kind: input, shape index: {}]   ;;  %s2904_s7 = inlined_call_operand.vmem [shape: f32[32,1], index: 7, kind: input, shape index: {}]   ;;  %s2905_s8 = inlined_call_operand.vmem [shape: f32[32,9], index: 8, kind: input, shape index: {}]   ;;  %s2906_s9 = inlined_call_operand.vmem [shape: f32[8,32], index: 9, kind: input, shape index: {}]   ;;  %s2907_s10 = inlined_call_operand.vmem [shape: f32[8,1], index: 10, kind: input, shape index: {}]   ;;  %s2908_s11 = inlined_call_operand.vmem [shape: f32[2,8,256], index: 11, kind: output, shape index: {}]  }
   0x1 LB: > { %s1688_s18 = sadd.s32 4294967295, %s1819_s17   ;;  %p1692_p0 = scmp.ge.s32.totalorder %s1819_s17, 1  ;;  %s1819_s17 = sphi %s1900_s17, %s21_s17  }
   0x2   : > { %p337_p1 = scmp.lt.s32.totalorder %s1819_s17, 3 }
   0x4   : > { %p338_p2 = pnand %p1692_p0, %p337_p1 }
   0x6   : > { %341 = sbr.rel (%p338_p2) target bundleno = 1644 (0x66c), region = 64 }
   0xd   : > { %p377_p3 = scmp.lt.s32.totalorder %s1688_s18, 1  ;;  %v1821_v0 = vmov 0.0   ;;  %v489_v3 = vld [vmem:[%s2900_s3] sm:$0xff]  ;;  %vm490_vm0 = vcmask 64512   ;;  %s1822_s25 = smov 1   ;;  %v397_v4 = vlaneseq  ;;  %v390_v9 = vld [vmem:[%s2899_s2 + $0x8] sm:$0xff] }
   0xe   : > { %558 = vmatprep.mubr.f32.mxu0 %v1821_v0  ;;  %726 = vmatprep.mubr.f32.mxu1 %v1821_v0  ;;  %s1823_s26 = smov 127   ;;  %v389_v8 = vld [vmem:[%s2899_s2] sm:$0xff]  ;;  %s1824_s12 = smov 16  }
   0xf   : > { %s3016_s18 = smov (!%p377_p3, %s1688_s18), 1  ;;  %v1937_v5 = vshrl.u32 %v397_v4, 7  ;;  %v1939_v6 = vand.u32 127, %v397_v4  ;;  %s1825_s13 = smov 112   ;;  %v473_v62 = vld [vmem:[%s2898_s1] sm:$0x3] }
  0x10   : > { %s1707_s19 = sshll.u32 %s3016_s18, 4  ;;  %s1836_s23 = smov 15  }
  0x11   : > { %s381_s22 = scalar_lea.vmem %s2897_s0, %s1707_s19  ;;  %v404_v7 = vsub.s32 3, %v1937_v5  ;;  %v423_v10 = vsub.s32 5, %v1937_v5  ;;  %vm399_vm1 = vcmp.lt.s32.totalorder %v1939_v6, 1  ;;  %vm418_vm2 = vcmp.lt.s32.totalorder %v1939_v6, 127  ;;  %s1837_s24 = smov 17  }
  0x12   : > { %v1918_v1 = vld [vmem:[%s381_s22 + $0x8] sm:$0xff]  ;;  %v1920_v2 = vld [vmem:[%s381_s22] sm:$0xff]  ;;  %v442_v39 = vsub.s32 1, %v1937_v5  ;;  %vm437_vm3 = vcmp.lt.s32.totalorder %v1939_v6, 16  ;;  %v461_v41 = vsub.s32 7, %v1937_v5  ;;  %vm456_vm4 = vcmp.lt.s32.totalorder %v1939_v6, 112 }
  0x13   : > { %494 = vmatprep.subr.mxu0 %v1918_v1  ;;  %393 = vrot.lane.b32.xlu0 %v1920_v2, %s1822_s25  ;;  %v1950_v13 = vrot.slane %v389_v8, %v404_v7  ;;  %v1952_v14 = vrot.slane %v390_v9, %v404_v7  ;;  %v1955_v15 = vrot.slane %v389_v8, %v423_v10  ;;  %v2002_v59 = vsub.s32 0, %v1937_v5  ;;  %s1838_s27 = smov 111   ;;  %s1839_s28 = smov 113  }
  0x14   : > { %495 = vmatpush1.msra.mxu0 %v1920_v2  ;;  %414 = vrot.lane.b32.xlu1 %v1920_v2, %s1823_s26  ;;  %v1957_v17 = vrot.slane %v390_v9, %v423_v10  ;;  %v1980_v43 = vrot.slane %v389_v8, %v442_v39  ;;  %v1982_v44 = vrot.slane %v390_v9, %v442_v39  ;;  %vm1015_vm13 = vcmp.lt.s32.totalorder %v1939_v6, 17 }
  0x15   : > { %1697 = vmatmul.mubr.msk.f32.vlgmr.msra.gmra.mrb[0].mxu0 %vm490_vm0, %v489_v3  ;;  %2945 = vst [vmem:[#allocation2_spill] sm:$0xff] %v1955_v15  ;;  %v1989_v48 = vrot.slane %v389_v8, %v461_v41  ;;  %v1991_v49 = vrot.slane %v390_v9, %v461_v41  ;;  %v478_v3 = vrot.slane %v473_v62, %v2002_v59  ;;  %vm1152_vm14 = vcmp.lt.s32.totalorder %v1939_v6, 15 }
  0x16   : > { %1622 = vmatprep.mubr.f32.mxu0 %v1821_v0  ;;  %v482_v4 = vrot.slane %v473_v62, %v442_v39  ;;  %v2075_v62 = vld [vmem:[%s2905_s8 + $0x10] sm:$0xff]  ;;  %vm1353_vm15 = vcmp.lt.s32.totalorder %v1939_v6, 113 }
  0x17   : > { %395 = vrot.lane.b32.xlu0 %v1918_v1, %s1822_s25  ;;  %2946 = vst [vmem:[#allocation3_spill] sm:$0xff] %v1991_v49 }
  0x18   : > { %416 = vrot.lane.b32.xlu1 %v1918_v1, %s1823_s26 }
  0x85   : > { %v394_v11 = vpop.permute.xlu0 %393 }
  0x86   : > { %v415_v12 = vpop.permute.xlu1 %414 }
  0x89   : > { %v396_v16 = vpop.permute.xlu0 %395 }
  0x8a   : > { %v400_v18 = vsel %vm399_vm1, %v394_v11, %v396_v16  ;;  %v401_v19 = vsel %vm399_vm1, %v396_v16, %v394_v11  ;;  %v417_v20 = vpop.permute.xlu1 %416 }
  0x8b   : > { %v410_v21 = vmul.f32 %v1950_v13, %v401_v19  ;;  %v411_v22 = vmul.f32 %v1952_v14, %v400_v18  ;;  %v419_v23 = vsel %vm418_vm2, %v415_v12, %v417_v20  ;;  %v420_v24 = vsel %vm418_vm2, %v417_v20, %v415_v12 }
  0x8c   : > { %v429_v25 = vmul.f32 %v1955_v15, %v419_v23  ;;  %v430_v28 = vmul.f32 %v1957_v17, %v420_v24 }
  0x8d   : > { %v412_v26 = vadd.f32 %v410_v21, %v1920_v2  ;;  %v413_v27 = vadd.f32 %v411_v22, %v1918_v1 }
  0x8f   : > { %v431_v29 = vadd.f32 %v429_v25, %v412_v26  ;;  %v432_v30 = vadd.f32 %v430_v28, %v413_v27 }
  0x91   : > { %433 = vrot.lane.b32.xlu1 %v431_v29, %s1824_s12 }
  0x95   : > { %435 = vrot.lane.b32.xlu1 %v432_v30, %s1824_s12 }
  0x99   : > { %452 = vrot.lane.b32.xlu1 %v431_v29, %s1825_s13 }
  0x9d   : > { %454 = vrot.lane.b32.xlu1 %v432_v30, %s1825_s13 }
  0xe8   : > { %v560_v31 = vpop.f32.mrb[0].mxu0 }
  0xe9   : > { %v562_v32 = vpop.f32.mrb[1].mxu0 }
  0xea   : > { %v565_v33 = vadd.f32 %v562_v32, %v560_v31 }
  0xec   : > { %566 = vadd.xlane.f32.xlu0 %v565_v33 }
 0x103   : > { %v434_v34 = vpop.permute.xlu1 %433 }
 0x107   : > { %v436_v35 = vpop.permute.xlu1 %435 }
 0x108   : > { %v438_v46 = vsel %vm437_vm3, %v434_v34, %v436_v35  ;;  %v439_v47 = vsel %vm437_vm3, %v436_v35, %v434_v34  ;;  %v614_v34 = vld [vmem:[%s2902_s5] sm:$0xff]  ;;  %v1826_v35 = vmov 0  }
 0x109   : > { %v448_v52 = vmul.f32 %v1980_v43, %v439_v47  ;;  %v449_v53 = vmul.f32 %v1982_v44, %v438_v46  ;;  %1745 = vset.pattern.permute.xlu1 %v1826_v35  ;;  %1744 = vset.pattern.permute.xlu0 %v1826_v35 }
 0x10b   : > { %v453_v37 = vpop.permute.xlu1 %452  ;;  %v450_v56 = vadd.f32 %v448_v52, %v431_v29  ;;  %v451_v57 = vadd.f32 %v449_v53, %v432_v30  ;;  %v605_v52 = vld [vmem:[%s2901_s4] sm:$0xff] }
 0x10f   : > { %v455_v45 = vpop.permute.xlu1 %454 }
 0x110   : > { %v457_v50 = vsel %vm456_vm4, %v453_v37, %v455_v45  ;;  %v458_v51 = vsel %vm456_vm4, %v455_v45, %v453_v37  ;;  %v627_v37 = vld [vmem:[%s2904_s7 + $0x8] sm:$0xff] }
 0x111   : > { %v467_v54 = vmul.f32 %v1989_v48, %v457_v50  ;;  %v468_v55 = vmul.f32 %v1991_v49, %v458_v51 }
 0x113   : > { %v469_v60 = vadd.f32 %v467_v54, %v450_v56  ;;  %v470_v61 = vadd.f32 %v468_v55, %v451_v57  ;;  %v629_v55 = vld [vmem:[%s2904_s7 + $0x18] sm:$0xff]  ;;  %v2053_v56 = vld [vmem:[%s2905_s8] sm:$0xff]  ;;  %v1827_v57 = vmov 4  }
 0x115   : > { %v471_v7 = vsub.f32 %v469_v60, %v1920_v2  ;;  %v472_v8 = vsub.f32 %v470_v61, %v1918_v1  ;;  %v2065_v60 = vld [vmem:[%s2905_s8 + $0x18] sm:$0xff]  ;;  %v1828_v61 = vmov 1  }
 0x117   : > { %v485_v9 = vmul.f32 %v478_v3, %v471_v7  ;;  %v486_v10 = vmul.f32 %v482_v4, %v472_v8  ;;  %v1830_v3 = vmov 3   ;;  %v1831_v4 = vmov 5  }
 0x119   : > { %v487_v11 = vsub.f32 %v485_v9, %v1920_v2  ;;  %v488_v12 = vsub.f32 %v486_v10, %v1918_v1 }
 0x179   : > { %v567_v36 = vpop.xlane.xlu0 %566 }
 0x17a   : > { %v568_v38 = vmul.f32 0.00390625, %v567_v36  ;;  %v626_v36 = vld [vmem:[%s2904_s7] sm:$0xff] }
 0x17c   : > { %v569_v40 = vsub.f32 0.0, %v568_v38  ;;  %v628_v38 = vld [vmem:[%s2904_s7 + $0x10] sm:$0xff] }
 0x17e   : > { %v570_v42 = vmul.f32 1.442695, %v569_v40 }
 0x180   : > { %1773 = vpow2.f32 %v570_v42 }
 0x18a   : > { %v1774_v58 = vpop.eup %1773 }
 0x18b   : > { %v572_v63 = vadd.f32 1.0, %v1774_v58  ;;  %v2058_v58 = vld [vmem:[%s2905_s8 + $0x8] sm:$0xff] }
 0x18d   : > { %1775 = vrcp.f32 %v572_v63  ;;  %v1829_v63 = vmov 2  }
 0x197   : > { %v1776_v16 = vpop.eup %1775 }
 0x198   : > { %v575_v18 = vmul.f32 %v1776_v16, %v487_v11  ;;  %v576_v19 = vmul.f32 %v1776_v16, %v488_v12  ;;  %v622_v16 = vld [vmem:[%s2903_s6] sm:$0xff] }
 0x19a   : > { %v2013_v20 = vadd.f32 %v575_v18, %v1920_v2  ;;  %v2016_v21 = vadd.f32 %v576_v19, %v1918_v1  ;;  %v623_v18 = vld [vmem:[%s2903_s6 + $0x8] sm:$0xff]  ;;  %v624_v19 = vld [vmem:[%s2903_s6 + $0x10] sm:$0xff] }
 0x19c   : > { %2947 = vst [vmem:[#allocation4_spill] sm:$0xff] %v2013_v20  ;;  %2948 = vst [vmem:[#allocation5_spill] sm:$0xff] %v2016_v21  ;;  %v579_v22 = vadd.f32 %v2016_v21, %v2013_v20 }
 0x19e   : > { %580 = vadd.xlane.f32.xlu1 %v579_v22  ;;  %v625_v22 = vld [vmem:[%s2903_s6 + $0x18] sm:$0xff] }
 0x1af   : > { %617 = vperm.xlu1 %1745, %v614_v34  }
 0x1b3   : > { %632 = vperm.xlu1 %1745, %v626_v36  }
 0x1b7   : > { %637 = vperm.xlu1 %1745, %v627_v37  }
 0x1bb   : > { %642 = vperm.xlu1 %1745, %v628_v38  }
 0x1bf   : > { %1746 = vset.pattern.permute.xlu1 %v1827_v57 }
 0x1c0   : > { %973 = vperm.xlu1 %1746, %v2053_v56  }
 0x1c4   : > { %1748 = vset.pattern.permute.xlu1 %v1826_v35 }
 0x1c5   : > { %1041 = vperm.xlu1 %1748, %v2053_v56  }
 0x1c9   : > { %1045 = vperm.xlu1 %1748, %v2058_v58  }
 0x1cd   : > { %1749 = vset.pattern.permute.xlu1 %v1828_v61 }
 0x1ce   : > { %1109 = vperm.xlu1 %1749, %v2058_v58  }
 0x1d2   : > { %1750 = vset.pattern.permute.xlu1 %v1827_v57 }
 0x1d3   : > { %983 = vperm.xlu1 %1750, %v2075_v62  }
 0x1d7   : > { %1752 = vset.pattern.permute.xlu1 %v1826_v35 }
 0x1d8   : > { %1053 = vperm.xlu1 %1752, %v2065_v60  }
 0x1dc   : > { %1753 = vset.pattern.permute.xlu1 %v1829_v63 }
 0x1dd   : > { %1178 = vperm.xlu1 %1753, %v2053_v56  }
 0x1e1   : > { %1755 = vset.pattern.permute.xlu1 %v1828_v61 }
 0x1e2   : > { %1117 = vperm.xlu1 %1755, %v2065_v60  }
 0x1e6   : > { %1756 = vset.pattern.permute.xlu1 %v1830_v3 }
 0x1e7   : > { %1242 = vperm.xlu1 %1756, %v2053_v56  }
 0x1eb   : > { %1758 = vset.pattern.permute.xlu1 %v1829_v63 }
 0x1ec   : > { %1190 = vperm.xlu1 %1758, %v2065_v60  }
 0x1f0   : > { %1759 = vset.pattern.permute.xlu1 %v1831_v4 }
 0x1f1   : > { %1306 = vperm.xlu1 %1759, %v2053_v56  }
 0x1f5   : > { %1761 = vset.pattern.permute.xlu1 %v1830_v3 }
 0x1f6   : > { %1254 = vperm.xlu1 %1761, %v2065_v60  }
 0x22b   : > { %v581_v23 = vpop.xlane.xlu1 %580 }
 0x22c   : > { %v582_v24 = vrot.slane %v581_v23, 4 }
 0x22e   : > { %v583_v25 = vadd.f32 %v582_v24, %v581_v23  ;;  %v1832_v23 = vmov 6   ;;  %v1833_v24 = vmov 7  }
 0x22f   : > { %v618_v10 = vpop.permute.xlu1 %617  ;;  %1762 = vset.pattern.permute.xlu1 %v1832_v23 }
 0x230   : > { %v584_v26 = vrot.slane %v583_v25, 2  ;;  %1379 = vperm.xlu1 %1762, %v2053_v56  }
 0x232   : > { %v585_v27 = vadd.f32 %v584_v26, %v583_v25 }
 0x233   : > { %v633_v25 = vpop.permute.xlu1 %632 }
 0x234   : > { %v586_v28 = vrot.slane %v585_v27, 1  ;;  %1764 = vset.pattern.permute.xlu1 %v1831_v4 }
 0x235   : > { %1318 = vperm.xlu1 %1764, %v2065_v60  }
 0x236   : > { %v587_v29 = vadd.f32 %v586_v28, %v585_v27 }
 0x238   : > { %v588_v30 = vmul.f32 0.00048828125, %v587_v29 }
 0x239   : > { %1765 = vset.pattern.permute.xlu1 %v1833_v24 }
 0x23a   : > { %v2021_v31 = vsub.f32 %v2013_v20, %v588_v30  ;;  %v2024_v2 = vsub.f32 %v2016_v21, %v588_v30  ;;  %1443 = vperm.xlu1 %1765, %v2053_v56  }
 0x23c   : > { %v591_v1 = vmul.f32 %v2021_v31, %v2021_v31  ;;  %v592_v32 = vmul.f32 %v2024_v2, %v2024_v2 }
 0x23e   : > { %v593_v33 = vadd.f32 %v592_v32, %v591_v1  ;;  %1767 = vset.pattern.permute.xlu1 %v1832_v23 }
 0x23f   : > { %1391 = vperm.xlu1 %1767, %v2065_v60  }
 0x240   : > { %594 = vadd.xlane.f32.xlu0 %v593_v33 }
 0x2cd   : > { %v595_v39 = vpop.xlane.xlu0 %594 }
 0x2ce   : > { %v596_v40 = vrot.slane %v595_v39, 4 }
 0x2d0   : > { %v597_v41 = vadd.f32 %v596_v40, %v595_v39 }
 0x2d2   : > { %v598_v42 = vrot.slane %v597_v41, 2 }
 0x2d4   : > { %v599_v45 = vadd.f32 %v598_v42, %v597_v41 }
 0x2d6   : > { %v600_v46 = vrot.slane %v599_v45, 1 }
 0x2d8   : > { %v601_v47 = vadd.f32 %v600_v46, %v599_v45 }
 0x2da   : > { %v602_v50 = vmul.f32 0.00048828125, %v601_v47 }
 0x2dc   : > { %v603_v51 = vadd.f32 1e-05, %v602_v50 }
 0x2de   : > { %1777 = vrsqrt.f32 %v603_v51 }
 0x2e8   : > { %v1778_v53 = vpop.eup %1777 }
 0x2e9   : > { %v606_v54 = vmul.f32 %v1778_v53, %v605_v52 }
 0x2eb   : > { %609 = vperm.xlu0 %1744, %v606_v54  }
 0x2ef   : > { %647 = vperm.xlu0 %1744, %v629_v55  }
 0x2f3   : > { %1747 = vset.pattern.permute.xlu0 %v1827_v57 }
 0x2f4   : > { %978 = vperm.xlu0 %1747, %v2058_v58  }
 0x2f8   : > { %988 = vperm.xlu0 %1747, %v2065_v60  }
 0x2fc   : > { %1751 = vset.pattern.permute.xlu0 %v1828_v61 }
 0x2fd   : > { %1105 = vperm.xlu0 %1751, %v2053_v56  }
 0x301   : > { %1113 = vperm.xlu0 %1751, %v2075_v62  }
 0x305   : > { %1754 = vset.pattern.permute.xlu0 %v1829_v63 }
 0x306   : > { %1182 = vperm.xlu0 %1754, %v2058_v58  }
 0x30a   : > { %1186 = vperm.xlu0 %1754, %v2075_v62  }
 0x30e   : > { %1757 = vset.pattern.permute.xlu0 %v1830_v3 }
 0x30f   : > { %1246 = vperm.xlu0 %1757, %v2058_v58  }
 0x313   : > { %1250 = vperm.xlu0 %1757, %v2075_v62  }
 0x317   : > { %1760 = vset.pattern.permute.xlu0 %v1831_v4 }
 0x318   : > { %1310 = vperm.xlu0 %1760, %v2058_v58  }
 0x31c   : > { %1314 = vperm.xlu0 %1760, %v2075_v62  }
 0x320   : > { %1763 = vset.pattern.permute.xlu0 %v1832_v23 }
 0x321   : > { %1383 = vperm.xlu0 %1763, %v2058_v58  }
 0x325   : > { %1387 = vperm.xlu0 %1763, %v2075_v62  }
 0x329   : > { %1766 = vset.pattern.permute.xlu0 %v1833_v24 }
 0x32a   : > { %1447 = vperm.xlu0 %1766, %v2058_v58  }
 0x32e   : > { %1451 = vperm.xlu0 %1766, %v2075_v62  }
 0x36a   : > { %v610_v7 = vpop.permute.xlu0 %609 }
 0x36b   : > { %v612_v8 = vmul.f32 %v610_v7, %v2021_v31  ;;  %v613_v9 = vmul.f32 %v610_v7, %v2024_v2  ;;  %v638_v31 = vpop.permute.xlu1 %637 }
 0x36d   : > { %v621_v11 = vadd.f32 %v618_v10, %v613_v9  ;;  %v620_v12 = vadd.f32 %v618_v10, %v612_v8 }
 0x36f   : > { %662 = vmatprep.subr.mxu1 %v621_v11 }
 0x370   : > { %663 = vmatpush1.msra.mxu1 %v620_v12 }
 0x371   : > { %1698 = vmatmul.mubr.msk.f32.vlgmr.msra.gmra.mrb[0].mxu1 %vm490_vm0, %v622_v16 }
 0x372   : > { %732 = vmatprep.mubr.f32.mxu1 %v1821_v0 }
 0x375   : > { %1699 = vmatmul.mubr.msk.f32.gmra.mrb[2].mxu1 %vm490_vm0, %v623_v18 }
 0x376   : > { %738 = vmatprep.mubr.f32.mxu1 %v1821_v0 }
 0x379   : > { %1700 = vmatmul.mubr.msk.f32.gmra.mrb[4].mxu1 %vm490_vm0, %v624_v19 }
 0x37a   : > { %744 = vmatprep.mubr.f32.mxu1 %v1821_v0  ;;  %v1834_v0 = vmov 8  }
 0x37b   : > { %1768 = vset.pattern.permute.xlu1 %v1834_v0  ;;  %1769 = vset.pattern.permute.xlu0 %v1834_v0 }
 0x37c   : > { %1516 = vperm.xlu1 %1768, %v2053_v56   ;;  %1520 = vperm.xlu0 %1769, %v2058_v58   ;;  %v643_v56 = vpop.permute.xlu1 %642 }
 0x37d   : > { %1701 = vmatmul.mubr.msk.f32.gmra.mrb[6].mxu1 %vm490_vm0, %v625_v22  ;;  %vm1490_vm0 = vcmp.lt.s32.totalorder %v1939_v6, 111 }
 0x380   : > { %1770 = vset.pattern.permute.xlu1 %v1833_v24  ;;  %1528 = vperm.xlu0 %1769, %v2065_v60  }
 0x381   : > { %1455 = vperm.xlu1 %1770, %v2065_v60  }
 0x384   : > { %1772 = vset.pattern.permute.xlu0 %v1826_v35 }
 0x385   : > { %1771 = vset.pattern.permute.xlu1 %v1834_v0  ;;  %1049 = vperm.xlu0 %1772, %v2075_v62  }
 0x386   : > { %1524 = vperm.xlu1 %1771, %v2075_v62   ;;  %v648_v62 = vpop.permute.xlu0 %647 }
 0x444   : > { %v728_v26 = vpop.f32.mrb[0].mxu1 }
 0x445   : > { %v2130_v27 = vadd.f32 %v728_v26, %v633_v25  ;;  %v730_v28 = vpop.f32.mrb[1].mxu1 }
 0x446   : > { %v2132_v29 = vadd.f32 %v730_v28, %v633_v25 }
 0x447   : > { %v2135_v30 = vmul.f32 0.70710677, %v2130_v27 }
 0x448   : > { %v2138_v2 = vmul.f32 0.70710677, %v2132_v29  ;;  %v734_v1 = vpop.f32.mrb[2].mxu1 }
 0x449   : > { %v783_v32 = vand.u32 2147483647, %v2135_v30  ;;  %v2141_v33 = vadd.f32 %v734_v1, %v638_v31  ;;  %v736_v34 = vpop.f32.mrb[3].mxu1  ;;  %vm767_vm7 = vcmp.ge.f32.partialorder %v2135_v30, 0.0 }
 0x44a   : > { %v784_v35 = vand.u32 2147483647, %v2138_v2  ;;  %v2144_v36 = vadd.f32 %v736_v34, %v638_v31  ;;  %vm768_vm8 = vcmp.ge.f32.partialorder %v2138_v2, 0.0 }
 0x44b   : > { %v791_v37 = vmul.f32 0.3275911, %v783_v32  ;;  %v2147_v39 = vmul.f32 0.70710677, %v2141_v33  ;;  %v895_v53 = vsub.f32 0.0, %v783_v32 }
 0x44c   : > { %v792_v38 = vmul.f32 0.3275911, %v784_v35  ;;  %v740_v41 = vpop.f32.mrb[4].mxu1  ;;  %v2151_v46 = vmul.f32 0.70710677, %v2144_v36  ;;  %v896_v57 = vsub.f32 0.0, %v784_v35 }
 0x44d   : > { %v799_v40 = vadd.f32 1.0, %v791_v37  ;;  %v785_v45 = vand.u32 2147483647, %v2147_v39  ;;  %v742_v47 = vpop.f32.mrb[5].mxu1  ;;  %v2156_v58 = vadd.f32 %v740_v41, %v643_v56  ;;  %v903_v60 = vmul.f32 %v895_v53, %v783_v32 }
 0x44e   : > { %v800_v42 = vadd.f32 1.0, %v792_v38  ;;  %v2154_v55 = vand.u32 2147483647, %v2151_v46  ;;  %v2159_v63 = vadd.f32 %v742_v47, %v643_v56  ;;  %v904_v3 = vmul.f32 %v896_v57, %v784_v35 }
 0x44f   : > { %1779 = vrcp.f32 %v799_v40  ;;  %v793_v50 = vmul.f32 0.3275911, %v785_v45  ;;  %v2162_v4 = vmul.f32 0.70710677, %v2156_v58  ;;  %v911_v11 = vmul.f32 1.442695, %v903_v60 }
 0x450   : > { %1781 = vrcp.f32 %v800_v42  ;;  %v746_v51 = vpop.f32.mrb[6].mxu1  ;;  %v794_v61 = vmul.f32 0.3275911, %v2154_v55  ;;  %v2172_v19 = vmul.f32 0.70710677, %v2159_v63  ;;  %v897_v26 = vsub.f32 0.0, %v785_v45 }
 0x451   : > { %v748_v52 = vpop.f32.mrb[7].mxu1  ;;  %v801_v54 = vadd.f32 1.0, %v793_v50  ;;  %v2164_v7 = vadd.f32 %v746_v51, %v648_v62  ;;  %v913_v24 = vmul.f32 1.442695, %v904_v3  ;;  %v2176_v0 = vand.u32 2147483647, %v2162_v4 }
 0x452   : > { %v802_v12 = vadd.f32 1.0, %v794_v61  ;;  %v2168_v16 = vadd.f32 %v748_v52, %v648_v62  ;;  %v1835_v32 = vmov -1.0   ;;  %v2187_v40 = vand.u32 2147483647, %v2172_v19 }
 0x453   : > { %1783 = vrcp.f32 %v801_v54  ;;  %v765_v22 = vmul.f32 0.70710677, %v2164_v7  ;;  %v905_v52 = vmul.f32 %v897_v26, %v785_v45  ;;  %v795_v56 = vmul.f32 0.3275911, %v2176_v0 }
 0x454   : > { %1785 = vrcp.f32 %v802_v12  ;;  %v766_v35 = vmul.f32 0.70710677, %v2168_v16  ;;  %vm769_vm9 = vcmp.ge.f32.partialorder %v2147_v39, 0.0  ;;  %vm770_vm10 = vcmp.ge.f32.partialorder %v2151_v46, 0.0 }
 0x455   : > { %vm773_vm5 = vcmp.ge.f32.partialorder %v765_v22, 0.0  ;;  %v789_v28 = vand.u32 2147483647, %v765_v22  ;;  %1787 = vpow2.f32 %v911_v11  ;;  %v803_v22 = vadd.f32 1.0, %v795_v56 }
 0x456   : > { %v2181_v34 = vsel %vm773_vm5, 1.0, %v1835_v32  ;;  %vm774_vm6 = vcmp.ge.f32.partialorder %v766_v35, 0.0  ;;  %v790_v47 = vand.u32 2147483647, %v766_v35  ;;  %vm771_vm11 = vcmp.ge.f32.partialorder %v2162_v4, 0.0 }
 0x457   : > { %v797_v41 = vmul.f32 0.3275911, %v789_v28  ;;  %v2191_v57 = vsel %vm774_vm6, 1.0, %v1835_v32  ;;  %vm772_vm12 = vcmp.ge.f32.partialorder %v2172_v19, 0.0 }
 0x458   : > { %v798_v60 = vmul.f32 0.3275911, %v790_v47 }
 0x459   : > { %v1780_v8 = vpop.eup %1779  ;;  %v805_v53 = vadd.f32 1.0, %v797_v41  ;;  %v901_v41 = vsub.f32 0.0, %v789_v28 }
 0x45a   : > { %v2166_v9 = vpop.eup %1781  ;;  %v823_v10 = vmul.f32 1.0614054, %v1780_v8 }
 0x45b   : > { %v824_v18 = vmul.f32 1.0614054, %v2166_v9  ;;  %1789 = vrcp.f32 %v805_v53  ;;  %v902_v53 = vsub.f32 0.0, %v790_v47 }
 0x45c   : > { %v831_v23 = vadd.f32 -1.4531521, %v823_v10  ;;  %v806_v10 = vadd.f32 1.0, %v798_v60  ;;  %1791 = vpow2.f32 %v913_v24 }
 0x45d   : > { %v832_v25 = vadd.f32 -1.4531521, %v824_v18  ;;  %v2178_v31 = vpop.eup %1783  ;;  %v915_v18 = vmul.f32 1.442695, %v905_v52 }
 0x45e   : > { %v839_v1 = vmul.f32 %v1780_v8, %v831_v23  ;;  %v825_v38 = vmul.f32 1.0614054, %v2178_v31  ;;  %v796_v23 = vmul.f32 0.3275911, %v2187_v40  ;;  %1793 = vrcp.f32 %v806_v10 }
 0x45f   : > { %v840_v37 = vmul.f32 %v2166_v9, %v832_v25  ;;  %1795 = vpow2.f32 %v915_v18  ;;  %v910_v18 = vmul.f32 %v902_v53, %v790_v47  ;;  %v776_v53 = vsel %vm768_vm8, 1.0, %v1835_v32 }
 0x460   : > { %v847_v42 = vadd.f32 1.4214138, %v839_v1  ;;  %v833_v51 = vadd.f32 -1.4531521, %v825_v38  ;;  %v2198_v1 = vpop.eup %1785  ;;  %1797 = vrcp.f32 %v803_v22 }
 0x461   : > { %v848_v50 = vadd.f32 1.4214138, %v840_v37  ;;  %v826_v52 = vmul.f32 1.0614054, %v2198_v1 }
 0x462   : > { %v855_v54 = vmul.f32 %v1780_v8, %v847_v42  ;;  %v841_v62 = vmul.f32 %v2178_v31, %v833_v51  ;;  %v1788_v42 = vpop.eup %1787 }
 0x463   : > { %v856_v61 = vmul.f32 %v2166_v9, %v848_v50  ;;  %v804_v50 = vadd.f32 1.0, %v796_v23 }
 0x464   : > { %v863_v3 = vadd.f32 -0.28449672, %v855_v54  ;;  %v849_v12 = vadd.f32 1.4214138, %v841_v62  ;;  %v909_v62 = vmul.f32 %v901_v41, %v789_v28  ;;  %v751_v28 = vmul.f32 0.5, %v2130_v27 }
 0x465   : > { %v864_v11 = vadd.f32 -0.28449672, %v856_v61  ;;  %v2204_v60 = vpop.eup %1789  ;;  %1799 = vrcp.f32 %v804_v50 }
 0x466   : > { %v871_v45 = vmul.f32 %v1780_v8, %v863_v3  ;;  %v857_v26 = vmul.f32 %v2178_v31, %v849_v12  ;;  %v1792_v10 = vpop.eup %1791  ;;  %v834_v12 = vadd.f32 -1.4531521, %v826_v52 }
 0x467   : > { %v872_v25 = vmul.f32 %v2166_v9, %v864_v11  ;;  %v775_v11 = vsel %vm767_vm7, 1.0, %v1835_v32 }
 0x468   : > { %v879_v35 = vadd.f32 0.2548296, %v871_v45  ;;  %v865_v38 = vadd.f32 -0.28449672, %v857_v26  ;;  %v2208_v45 = vpop.eup %1793  ;;  %v842_v47 = vmul.f32 %v2198_v1, %v834_v12  ;;  %v898_v12 = vsub.f32 0.0, %v2154_v55 }
 0x469   : > { %v880_v37 = vadd.f32 0.2548296, %v872_v25  ;;  %v923_v25 = vmul.f32 1.442695, %v909_v62  ;;  %v830_v26 = vmul.f32 1.0614054, %v2208_v45 }
 0x46a   : > { %v887_v24 = vmul.f32 %v1780_v8, %v879_v35  ;;  %v873_v51 = vmul.f32 %v2178_v31, %v865_v38  ;;  %v829_v8 = vmul.f32 1.0614054, %v2204_v60  ;;  %v1796_v38 = vpop.eup %1795  ;;  %v906_v39 = vmul.f32 %v898_v12, %v2154_v55 }
 0x46b   : > { %v888_v56 = vmul.f32 %v2166_v9, %v880_v37  ;;  %v838_v41 = vadd.f32 -1.4531521, %v830_v26  ;;  %1801 = vpow2.f32 %v923_v25 }
 0x46c   : > { %v927_v54 = vmul.f32 %v1788_v42, %v887_v24  ;;  %v881_v61 = vadd.f32 0.2548296, %v873_v51  ;;  %v837_v9 = vadd.f32 -1.4531521, %v829_v8  ;;  %v925_v42 = vmul.f32 1.442695, %v910_v18  ;;  %v2216_v24 = vpop.eup %1797 }
 0x46d   : > { %v928_v30 = vmul.f32 %v1792_v10, %v888_v56  ;;  %v846_v27 = vmul.f32 %v2208_v45, %v838_v41  ;;  %v827_v56 = vmul.f32 1.0614054, %v2216_v24 }
 0x46e   : > { %v935_v3 = vsub.f32 1.0, %v927_v54  ;;  %v889_v23 = vmul.f32 %v2178_v31, %v881_v61  ;;  %v845_v37 = vmul.f32 %v2204_v60, %v837_v9  ;;  %v850_v54 = vadd.f32 1.4214138, %v842_v47 }
 0x46f   : > { %v936_v31 = vsub.f32 1.0, %v928_v30  ;;  %v854_v61 = vadd.f32 1.4214138, %v846_v27  ;;  %v2229_v62 = vpop.eup %1799  ;;  %1803 = vpow2.f32 %v925_v42  ;;  %v752_v47 = vmul.f32 0.5, %v2132_v29 }
 0x470   : > { %v943_v22 = vmul.f32 %v935_v3, %v775_v11  ;;  %v929_v51 = vmul.f32 %v1796_v38, %v889_v23  ;;  %v853_v52 = vadd.f32 1.4214138, %v845_v37  ;;  %v2231_v11 = vpop.permute.xlu1 %973  ;;  %v835_v23 = vadd.f32 -1.4531521, %v827_v56 }
 0x471   : > { %v944_v3 = vmul.f32 %v936_v31, %v776_v53  ;;  %v862_v18 = vmul.f32 %v2208_v45, %v854_v61  ;;  %v828_v9 = vmul.f32 1.0614054, %v2229_v62  ;;  %v753_v61 = vmul.f32 0.5, %v2141_v33 }
 0x472   : > { %v951_v35 = vadd.f32 1.0, %v943_v22  ;;  %v861_v2 = vmul.f32 %v2204_v60, %v853_v52  ;;  %v937_v8 = vsub.f32 1.0, %v929_v51  ;;  %v777_v22 = vsel %vm769_vm9, 1.0, %v1835_v32 }
 0x473   : > { %v870_v25 = vadd.f32 -0.28449672, %v862_v18  ;;  %v952_v26 = vadd.f32 1.0, %v944_v3  ;;  %v843_v51 = vmul.f32 %v2216_v24, %v835_v23  ;;  %v836_v52 = vadd.f32 -1.4531521, %v828_v9 }
 0x474   : > { %v2218_v50 = vmul.f32 %v951_v35, %v751_v28  ;;  %v869_v10 = vadd.f32 -0.28449672, %v861_v2  ;;  %v945_v28 = vmul.f32 %v937_v8, %v777_v22  ;;  %v858_v35 = vmul.f32 %v2198_v1, %v850_v54  ;;  %v2249_v42 = vpop.permute.xlu1 %1041 }
 0x475   : > { %v878_v38 = vmul.f32 %v2208_v45, %v870_v25  ;;  %v1802_v31 = vpop.eup %1801  ;;  %v2256_v27 = vmul.f32 %v952_v26, %v752_v47  ;;  %v844_v8 = vmul.f32 %v2229_v62, %v836_v52  ;;  %v851_v22 = vadd.f32 1.4214138, %v843_v51  ;;  %v2273_v26 = vpop.permute.xlu0 %978 }
 0x476   : > { %1136 = vrot.lane.b32.xlu0 %v2218_v50, %s1836_s23  ;;  %999 = vrot.lane.b32.xlu1 %v2218_v50, %s1837_s24  ;;  %v877_v30 = vmul.f32 %v2204_v60, %v869_v10  ;;  %v953_v53 = vadd.f32 1.0, %v945_v28  ;;  %v866_v29 = vadd.f32 -0.28449672, %v858_v35  ;;  %v899_v33 = vsub.f32 0.0, %v2176_v0 }
 0x477   : > { %v886_v55 = vadd.f32 0.2548296, %v878_v38  ;;  %v757_v9 = vmul.f32 0.5, %v2164_v7  ;;  %v859_v35 = vmul.f32 %v2216_v24, %v851_v22  ;;  %v900_v7 = vsub.f32 0.0, %v2187_v40 }
 0x478   : > { %v885_v37 = vadd.f32 0.2548296, %v877_v30  ;;  %v2265_v12 = vmul.f32 %v953_v53, %v753_v61  ;;  %v874_v18 = vmul.f32 %v2198_v1, %v866_v29  ;;  %v2269_v30 = vpop.permute.xlu1 %1045  ;;  %v907_v38 = vmul.f32 %v899_v33, %v2176_v0 }
 0x479   : > { %v894_v54 = vmul.f32 %v2208_v45, %v886_v55  ;;  %v1804_v56 = vpop.eup %1803  ;;  %v758_v47 = vmul.f32 0.5, %v2168_v16  ;;  %v2288_v51 = vpop.permute.xlu0 %988  ;;  %v867_v0 = vadd.f32 -0.28449672, %v859_v35  ;;  %v908_v16 = vmul.f32 %v900_v7, %v2187_v40 }
 0x47a   : > { %1209 = vrot.lane.b32.xlu0 %v2218_v50, %s1822_s25  ;;  %1072 = vrot.lane.b32.xlu1 %v2218_v50, %s1824_s12  ;;  %v893_v41 = vmul.f32 %v2204_v60, %v885_v37  ;;  %v917_v60 = vmul.f32 1.442695, %v906_v39  ;;  %v852_v37 = vadd.f32 1.4214138, %v844_v8  ;;  %2950 = vst [vmem:[#allocation7_spill] sm:$0xff] %v2288_v51  ;;  %v778_v22 = vsel %vm770_vm10, 1.0, %v1835_v32 }
 0x47b   : > { %v934_v10 = vmul.f32 %v1804_v56, %v894_v54  ;;  %v919_v53 = vmul.f32 1.442695, %v907_v38  ;;  %v875_v54 = vmul.f32 %v2216_v24, %v867_v0  ;;  %v921_v61 = vmul.f32 1.442695, %v908_v16 }
 0x47c   : > { %v933_v2 = vmul.f32 %v1802_v31, %v893_v41  ;;  %1805 = vpow2.f32 %v917_v60  ;;  %v2286_v31 = vpop.permute.xlu1 %1109  ;;  %v860_v55 = vmul.f32 %v2229_v62, %v852_v37  ;;  %v754_v37 = vmul.f32 0.5, %v2144_v36 }
 0x47d   : > { %v942_v23 = vsub.f32 1.0, %v934_v10  ;;  %v2303_v29 = vpop.permute.xlu0 %1105  ;;  %1807 = vpow2.f32 %v919_v53  ;;  %v779_v36 = vsel %vm771_vm11, 1.0, %v1835_v32  ;;  %v780_v53 = vsel %vm772_vm12, 1.0, %v1835_v32 }
 0x47e   : > { %1273 = vrot.lane.b32.xlu0 %v2218_v50, %s1823_s26  ;;  %1474 = vrot.lane.b32.xlu1 %v2218_v50, %s1838_s27  ;;  %v941_v3 = vsub.f32 1.0, %v933_v2  ;;  %v868_v56 = vadd.f32 -0.28449672, %v860_v55  ;;  %1809 = vpow2.f32 %v921_v61 }
 0x47f   : > { %v950_v28 = vmul.f32 %v942_v23, %v2191_v57 }
 0x480   : > { %v949_v45 = vmul.f32 %v941_v3, %v2181_v34  ;;  %v882_v34 = vadd.f32 0.2548296, %v874_v18  ;;  %v883_v3 = vadd.f32 0.2548296, %v875_v54  ;;  %v876_v8 = vmul.f32 %v2229_v62, %v868_v56 }
 0x481   : > { %v958_v41 = vadd.f32 1.0, %v950_v28  ;;  %v2316_v18 = vpop.permute.xlu0 %1113 }
 0x482   : > { %1337 = vrot.lane.b32.xlu0 %v2218_v50, %s1839_s28  ;;  %1482 = vrot.lane.b32.xlu1 %v2256_v27, %s1838_s27  ;;  %v957_v25 = vadd.f32 1.0, %v949_v45  ;;  %v890_v52 = vmul.f32 %v2198_v1, %v882_v34  ;;  %v2306_v1 = vpop.permute.xlu1 %983  ;;  %2954 = vst [vmem:[#allocation11_spill] sm:$0xff] %v2316_v18  ;;  %v891_v46 = vmul.f32 %v2216_v24, %v883_v3  ;;  %v884_v33 = vadd.f32 0.2548296, %v876_v8 }
 0x483   : > { %v2294_v57 = vmul.f32 %v958_v41, %v758_v47  ;;  %2952 = vst [vmem:[#allocation9_spill] sm:$0xff] %v2306_v1 }
 0x484   : > { %v2281_v39 = vmul.f32 %v957_v25, %v757_v9  ;;  %v892_v35 = vmul.f32 %v2229_v62, %v884_v33 }
 0x485   : > { %2951 = vst [vmem:[#allocation8_spill] sm:$0xff] %v2294_v57  ;;  %v2330_v9 = vpop.permute.xlu0 %1182 }
 0x486   : > { %1410 = vrot.lane.b32.xlu0 %v2218_v50, %s1825_s13  ;;  %1001 = vrot.lane.b32.xlu1 %v2265_v12, %s1837_s24  ;;  %2949 = vst [vmem:[#allocation6_spill] sm:$0xff] %v2281_v39  ;;  %v1806_v2 = vpop.eup %1805  ;;  %v2314_v10 = vpop.permute.xlu1 %1053 }
 0x487   : > { %v930_v60 = vmul.f32 %v1806_v2, %v890_v52  ;;  %2953 = vst [vmem:[#allocation10_spill] sm:$0xff] %v2314_v10  ;;  %v1808_v25 = vpop.eup %1807 }
 0x488   : > { %v931_v34 = vmul.f32 %v1808_v25, %v891_v46  ;;  %v1810_v24 = vpop.eup %1809 }
 0x489   : > { %v938_v40 = vsub.f32 1.0, %v930_v60  ;;  %v932_v47 = vmul.f32 %v1810_v24, %v892_v35  ;;  %v2343_v52 = vpop.permute.xlu0 %1186  ;;  %v755_v60 = vmul.f32 0.5, %v2156_v58 }
 0x48a   : > { %1007 = vrot.lane.b32.xlu0 %v2256_v27, %s1837_s24  ;;  %1074 = vrot.lane.b32.xlu1 %v2265_v12, %s1824_s12  ;;  %v2328_v23 = vpop.permute.xlu1 %1178  ;;  %v939_v7 = vsub.f32 1.0, %v931_v34  ;;  %2956 = vst [vmem:[#allocation13_spill] sm:$0xff] %v2343_v52 }
 0x48b   : > { %v946_v45 = vmul.f32 %v938_v40, %v778_v22  ;;  %v940_v0 = vsub.f32 1.0, %v932_v47  ;;  %v756_v40 = vmul.f32 0.5, %v2159_v63 }
 0x48c   : > { %v947_v62 = vmul.f32 %v939_v7, %v779_v36 }
 0x48d   : > { %v954_v28 = vadd.f32 1.0, %v946_v45  ;;  %v2357_v55 = vpop.permute.xlu0 %1246  ;;  %v948_v2 = vmul.f32 %v940_v0, %v780_v53 }
 0x48e   : > { %1080 = vrot.lane.b32.xlu0 %v2256_v27, %s1824_s12  ;;  %1138 = vrot.lane.b32.xlu1 %v2265_v12, %s1836_s23  ;;  %v2341_v41 = vpop.permute.xlu1 %1117  ;;  %2957 = vst [vmem:[#allocation14_spill] sm:$0xff] %v2357_v55  ;;  %v955_v16 = vadd.f32 1.0, %v947_v62 }
 0x48f   : > { %v2338_v38 = vmul.f32 %v954_v28, %v754_v37  ;;  %2955 = vst [vmem:[#allocation12_spill] sm:$0xff] %v2341_v41  ;;  %v956_v54 = vadd.f32 1.0, %v948_v2  ;;  %v1548_v37 = vld [vmem:[%s2907_s10] sm:$0xff] }
 0x490   : > { %v2365_v19 = vmul.f32 %v955_v16, %v755_v60 }
 0x491   : > { %v2369_v61 = vpop.permute.xlu0 %1250  ;;  %v2376_v58 = vmul.f32 %v956_v54, %v756_v40 }
 0x492   : > { %1144 = vrot.lane.b32.xlu0 %v2256_v27, %s1836_s23  ;;  %1211 = vrot.lane.b32.xlu1 %v2265_v12, %s1822_s25  ;;  %v2355_v4 = vpop.permute.xlu1 %1242  ;;  %2958 = vst [vmem:[#allocation15_spill] sm:$0xff] %v2365_v19  ;;  %2960 = vst [vmem:[#allocation17_spill] sm:$0xff] %v2369_v61 }
 0x493   : > { %2961 = vst [vmem:[#allocation18_spill] sm:$0xff] %v2376_v58 }
 0x495   : > { %v2384_v3 = vpop.permute.xlu0 %1310 }
 0x496   : > { %1217 = vrot.lane.b32.xlu0 %v2256_v27, %s1822_s25  ;;  %1275 = vrot.lane.b32.xlu1 %v2265_v12, %s1823_s26  ;;  %v2367_v56 = vpop.permute.xlu1 %1190  ;;  %2962 = vst [vmem:[#allocation19_spill] sm:$0xff] %v2384_v3 }
 0x497   : > { %2959 = vst [vmem:[#allocation16_spill] sm:$0xff] %v2367_v56  ;;  %v1163_v56 = vsub.s32 2, %v1937_v5 }
 0x499   : > { %v2392_v8 = vpop.permute.xlu0 %1314 }
 0x49a   : > { %1281 = vrot.lane.b32.xlu0 %v2256_v27, %s1823_s26  ;;  %1339 = vrot.lane.b32.xlu1 %v2265_v12, %s1839_s28  ;;  %v2382_v32 = vpop.permute.xlu1 %1306  ;;  %2964 = vst [vmem:[#allocation21_spill] sm:$0xff] %v2392_v8 }
 0x49d   : > { %v2404_v45 = vpop.permute.xlu0 %1383 }
 0x49e   : > { %1345 = vrot.lane.b32.xlu0 %v2256_v27, %s1839_s28  ;;  %1412 = vrot.lane.b32.xlu1 %v2265_v12, %s1825_s13  ;;  %v2390_v63 = vpop.permute.xlu1 %1254  ;;  %2965 = vst [vmem:[#allocation22_spill] sm:$0xff] %v2404_v45 }
 0x49f   : > { %2963 = vst [vmem:[#allocation20_spill] sm:$0xff] %v2390_v63 }
 0x4a1   : > { %v2412_v33 = vpop.permute.xlu0 %1387 }
 0x4a2   : > { %1418 = vrot.lane.b32.xlu0 %v2256_v27, %s1825_s13  ;;  %1009 = vrot.lane.b32.xlu1 %v2338_v38, %s1837_s24  ;;  %v2402_v22 = vpop.permute.xlu1 %1379  ;;  %2967 = vst [vmem:[#allocation24_spill] sm:$0xff] %v2412_v33 }
 0x4a5   : > { %v2424_v28 = vpop.permute.xlu0 %1447 }
 0x4a6   : > { %1476 = vrot.lane.b32.xlu0 %v2265_v12, %s1838_s27  ;;  %1082 = vrot.lane.b32.xlu1 %v2338_v38, %s1824_s12  ;;  %v2410_v46 = vpop.permute.xlu1 %1318  ;;  %2968 = vst [vmem:[#allocation25_spill] sm:$0xff] %v2424_v28 }
 0x4a7   : > { %2966 = vst [vmem:[#allocation23_spill] sm:$0xff] %v2410_v46  ;;  %v1811_v46 = vld [vmem:[%s2899_s2] sm:$0xff] }
 0x4a8   : > { %v2500_v63 = vrot.slane %v1811_v46, %v2002_v59  ;;  %v2513_v8 = vrot.slane %v1811_v46, %v1163_v56 }
 0x4a9   : > { %v2432_v35 = vpop.permute.xlu0 %1451 }
 0x4aa   : > { %1484 = vrot.lane.b32.xlu0 %v2338_v38, %s1838_s27  ;;  %1146 = vrot.lane.b32.xlu1 %v2338_v38, %s1836_s23  ;;  %v2422_v25 = vpop.permute.xlu1 %1443  ;;  %2970 = vst [vmem:[#allocation27_spill] sm:$0xff] %v2432_v35 }
 0x4ad   : > { %v2445_v7 = vpop.permute.xlu0 %1520 }
 0x4ae   : > { %1219 = vrot.lane.b32.xlu1 %v2338_v38, %s1822_s25  ;;  %1478 = vrot.lane.b32.xlu0 %v2365_v19, %s1838_s27  ;;  %v2430_v34 = vpop.permute.xlu1 %1391  ;;  %2971 = vst [vmem:[#allocation28_spill] sm:$0xff] %v2445_v7  ;;  %v991_v7 = vmul.f32 %v2231_v11, %v2218_v50  ;;  %v2978_v50 = vsub.s32 6, %v1937_v5 }
 0x4af   : > { %2969 = vst [vmem:[#allocation26_spill] sm:$0xff] %v2430_v34 }
 0x4b1   : > { %v2451_v36 = vpop.permute.xlu0 %1528 }
 0x4b2   : > { %1283 = vrot.lane.b32.xlu1 %v2338_v38, %s1823_s26  ;;  %1011 = vrot.lane.b32.xlu0 %v2376_v58, %s1837_s24  ;;  %v2443_v24 = vpop.permute.xlu1 %1516  ;;  %2973 = vst [vmem:[#allocation30_spill] sm:$0xff] %v2451_v36 }
 0x4b5   : > { %v2457_v62 = vpop.permute.xlu0 %1049 }
 0x4b6   : > { %1347 = vrot.lane.b32.xlu1 %v2338_v38, %s1839_s28  ;;  %1084 = vrot.lane.b32.xlu0 %v2376_v58, %s1824_s12  ;;  %v2449_v47 = vpop.permute.xlu1 %1455  ;;  %2974 = vst [vmem:[#allocation31_spill] sm:$0xff] %v2457_v62 }
 0x4b7   : > { %2972 = vst [vmem:[#allocation29_spill] sm:$0xff] %v2449_v47 }
 0x4ba   : > { %1420 = vrot.lane.b32.xlu1 %v2338_v38, %s1825_s13  ;;  %1148 = vrot.lane.b32.xlu0 %v2376_v58, %s1836_s23  ;;  %v2459_v0 = vpop.permute.xlu1 %1524 }
 0x4bb   : > { %2975 = vst [vmem:[#allocation32_spill] sm:$0xff] %v2459_v0 }
 0x4be   : > { %1221 = vrot.lane.b32.xlu0 %v2376_v58, %s1822_s25  ;;  %1003 = vrot.lane.b32.xlu1 %v2365_v19, %s1837_s24 }
 0x4c2   : > { %1285 = vrot.lane.b32.xlu0 %v2376_v58, %s1823_s26  ;;  %1076 = vrot.lane.b32.xlu1 %v2365_v19, %s1824_s12 }
 0x4c6   : > { %1422 = vrot.lane.b32.xlu0 %v2376_v58, %s1825_s13  ;;  %1140 = vrot.lane.b32.xlu1 %v2365_v19, %s1836_s23 }
 0x4ca   : > { %1343 = vrot.lane.b32.xlu0 %v2281_v39, %s1839_s28  ;;  %1213 = vrot.lane.b32.xlu1 %v2365_v19, %s1822_s25 }
 0x4ce   : > { %1351 = vrot.lane.b32.xlu0 %v2294_v57, %s1839_s28  ;;  %1277 = vrot.lane.b32.xlu1 %v2365_v19, %s1823_s26 }
 0x4d2   : > { %1486 = vrot.lane.b32.xlu0 %v2376_v58, %s1838_s27  ;;  %1341 = vrot.lane.b32.xlu1 %v2365_v19, %s1839_s28 }
 0x4d6   : > { %1551 = vperm.xlu0 %1772, %v1548_v37   ;;  %1414 = vrot.lane.b32.xlu1 %v2365_v19, %s1825_s13 }
 0x4da   : > { %1349 = vrot.lane.b32.xlu1 %v2376_v58, %s1839_s28 }
 0x4de   : > { %1005 = vrot.lane.b32.xlu1 %v2281_v39, %s1837_s24 }
 0x4e2   : > { %1078 = vrot.lane.b32.xlu1 %v2281_v39, %s1824_s12 }
 0x4e6   : > { %1142 = vrot.lane.b32.xlu1 %v2281_v39, %s1836_s23 }
 0x4e8   : > { %v2463_v53 = vpop.permute.xlu0 %1136  ;;  %v1000_v16 = vpop.permute.xlu1 %999 }
 0x4ea   : > { %1215 = vrot.lane.b32.xlu1 %v2281_v39, %s1822_s25 }
 0x4ec   : > { %v2467_v2 = vpop.permute.xlu0 %1209  ;;  %v1073_v60 = vpop.permute.xlu1 %1072 }
 0x4ee   : > { %1279 = vrot.lane.b32.xlu1 %v2281_v39, %s1823_s26 }
 0x4f0   : > { %v2471_v54 = vpop.permute.xlu0 %1273  ;;  %v2473_v40 = vpop.permute.xlu1 %1474 }
 0x4f2   : > { %1416 = vrot.lane.b32.xlu1 %v2281_v39, %s1825_s13 }
 0x4f4   : > { %v2477_v37 = vpop.permute.xlu0 %1337  ;;  %v2479_v21 = vpop.permute.xlu1 %1482 }
 0x4f6   : > { %1480 = vrot.lane.b32.xlu1 %v2281_v39, %s1838_s27 }
 0x4f8   : > { %v2483_v20 = vpop.permute.xlu0 %1410  ;;  %v2485_v36 = vpop.permute.xlu1 %1001 }
 0x4fa   : > { %1013 = vrot.lane.b32.xlu1 %v2294_v57, %s1837_s24 }
 0x4fc   : > { %v1008_v0 = vpop.permute.xlu0 %1007  ;;  %v2489_v47 = vpop.permute.xlu1 %1074 }
 0x4fd   : > { %v1020_v41 = vsel %vm1015_vm13, %v1008_v0, %v1000_v16 }
 0x4fe   : > { %1086 = vrot.lane.b32.xlu1 %v2294_v57, %s1824_s12  ;;  %v1032_v33 = vmul.f32 %v2500_v63, %v1020_v41 }
 0x500   : > { %v1081_v35 = vpop.permute.xlu0 %1080  ;;  %v2494_v34 = vpop.permute.xlu1 %1138  ;;  %v1056_v41 = vmul.f32 %v2249_v42, %v1032_v33 }
 0x501   : > { %v1092_v10 = vsel %vm437_vm3, %v1081_v35, %v1073_v60 }
 0x502   : > { %1150 = vrot.lane.b32.xlu1 %v2294_v57, %s1836_s23  ;;  %v1096_v52 = vmul.f32 %v1092_v10, %v1980_v43 }
 0x504   : > { %v1145_v51 = vpop.permute.xlu0 %1144  ;;  %v2508_v39 = vpop.permute.xlu1 %1211  ;;  %v1120_v10 = vmul.f32 %v2303_v29, %v1096_v52  ;;  %v1812_v52 = vld [vmem:[%s2899_s2 + $0x8] sm:$0xff] }
 0x505   : > { %v1157_v61 = vsel %vm1152_vm14, %v1145_v51, %v2463_v53 }
 0x506   : > { %1223 = vrot.lane.b32.xlu1 %v2294_v57, %s1822_s25  ;;  %v1169_v19 = vmul.f32 %v2513_v8, %v1157_v61  ;;  %v1064_v61 = vadd.f32 %v1056_v41, %v991_v7 }
 0x508   : > { %v1218_v18 = vpop.permute.xlu0 %1217  ;;  %v2521_v58 = vpop.permute.xlu1 %1275  ;;  %v1193_v55 = vmul.f32 %v2328_v23, %v1169_v19  ;;  %v1016_v19 = vsel %vm1015_vm13, %v1000_v16, %v1008_v0  ;;  %v1128_v7 = vadd.f32 %v1120_v10, %v1064_v61  ;;  %v1491_v0 = vsel %vm1490_vm0, %v2473_v40, %v2479_v21 }
 0x509   : > { %2976 = vst [vmem:[#allocation33_spill] sm:$0xff] %v2521_v58  ;;  %v1229_v1 = vsel %vm399_vm1, %v1218_v18, %v2467_v2 }
 0x50a   : > { %1287 = vrot.lane.b32.xlu1 %v2294_v57, %s1823_s26  ;;  %v1233_v28 = vmul.f32 %v1229_v1, %v1950_v13  ;;  %v2547_v1 = vrot.slane %v1811_v46, %v2978_v50  ;;  %v1088_v50 = vsel %vm437_vm3, %v1073_v60, %v1081_v35 }
 0x50c   : > { %v1282_v45 = vpop.permute.xlu0 %1281  ;;  %v2535_v3 = vpop.permute.xlu1 %1339  ;;  %v1257_v41 = vmul.f32 %v2355_v4, %v1233_v28  ;;  %v2573_v28 = vld [vmem:[%s2899_s2 + $0x10] ss:$0 sm:$0xff] }
 0x50d   : > { %2977 = vst [vmem:[#allocation34_spill] sm:$0xff] %v2535_v3  ;;  %v1289_v33 = vsel %vm418_vm2, %v2471_v54, %v1282_v45  ;;  %v2553_v3 = vrot.slane %v1812_v52, %v2002_v59  ;;  %v1201_v59 = vadd.f32 %v1193_v55, %v1128_v7  ;;  %v2580_v55 = vrot.slane %v1812_v52, %v1163_v56 }
 0x50e   : > { %v1297_v62 = vmul.f32 %v1289_v33, %v1955_v15  ;;  %1424 = vrot.lane.b32.xlu1 %v2294_v57, %s1825_s13  ;;  %v1097_v7 = vmul.f32 %v1088_v50, %v1982_v44 }
 0x50f   : > { %v1033_v35 = vmul.f32 %v2553_v3, %v1016_v19  ;;  %v1265_v16 = vadd.f32 %v1257_v41, %v1201_v59 }
 0x510   : > { %v1346_v33 = vpop.permute.xlu0 %1345  ;;  %v2559_v49 = vpop.permute.xlu1 %1412  ;;  %v1321_v15 = vmul.f32 %v2382_v32, %v1297_v62  ;;  %v1153_v62 = vsel %vm1152_vm14, %v2463_v53, %v1145_v51 }
 0x511   : > { %2979 = vst [vmem:[#allocation35_spill] sm:$0xff] %v2559_v49  ;;  %v1354_v46 = vsel %vm1353_vm15, %v2477_v37, %v1346_v33  ;;  %v1057_v49 = vmul.f32 %v2249_v42, %v1033_v35  ;;  %v1170_v51 = vmul.f32 %v2580_v55, %v1153_v62  ;;  %v1121_v42 = vmul.f32 %v2303_v29, %v1097_v7 }
 0x512   : > { %v1370_v58 = vmul.f32 %v2547_v1, %v1354_v46  ;;  %1488 = vrot.lane.b32.xlu1 %v2294_v57, %s1838_s27  ;;  %v1507_v57 = vmul.f32 %v2573_v28, %v1491_v0  ;;  %v1329_v19 = vadd.f32 %v1321_v15, %v1265_v16  ;;  %v992_v0 = vmul.f32 %v2231_v11, %v2256_v27  ;;  %s386_s27 = scalar_lea.vmem %s2908_s11, %s1707_s19 }
 0x514   : > { %v1394_v60 = vmul.f32 %v2402_v22, %v1370_v58  ;;  %v1419_v10 = vpop.permute.xlu0 %1418  ;;  %v1010_v61 = vpop.permute.xlu1 %1009  ;;  %v1225_v58 = vsel %vm399_vm1, %v2467_v2, %v1218_v18  ;;  %v1531_v18 = vmul.f32 %v2443_v24, %v1507_v57  ;;  %v1065_v16 = vadd.f32 %v1057_v49, %v992_v0 }
 0x515   : > { %v1426_v46 = vsel %vm456_vm4, %v2483_v20, %v1419_v10  ;;  %v1021_v50 = vsel %vm1015_vm13, %v1010_v61, %v2485_v36  ;;  %v1017_v35 = vsel %vm1015_vm13, %v2485_v36, %v1010_v61  ;;  %v1234_v2 = vmul.f32 %v1225_v58, %v1952_v14 }
 0x516   : > { %v1434_v56 = vmul.f32 %v1426_v46, %v1989_v48  ;;  %v1402_v53 = vadd.f32 %v1394_v60, %v1329_v19  ;;  %v1194_v60 = vmul.f32 %v2328_v23, %v1170_v51  ;;  %v1293_v46 = vsel %vm418_vm2, %v1282_v45, %v2471_v54 }
 0x517   : > { %v1034_v11 = vmul.f32 %v2500_v63, %v1021_v50  ;;  %v1035_v29 = vmul.f32 %v2553_v3, %v1017_v35  ;;  %v1129_v61 = vadd.f32 %v1121_v42, %v1065_v16  ;;  %v1258_v7 = vmul.f32 %v2355_v4, %v1234_v2 }
 0x518   : > { %v1458_v41 = vmul.f32 %v2422_v25, %v1434_v56  ;;  %v2601_v59 = vpop.permute.xlu0 %1476  ;;  %v1083_v15 = vpop.permute.xlu1 %1082  ;;  %v1298_v45 = vmul.f32 %v1293_v46, %v1957_v17  ;;  %v2980_v56 = vsub.s32 6, %v1937_v5  ;;  %v1358_v4 = vsel %vm1353_vm15, %v1346_v33, %v2477_v37 }
 0x519   : > { %v1089_v57 = vsel %vm437_vm3, %v2489_v47, %v1083_v15  ;;  %v1093_v49 = vsel %vm437_vm3, %v1083_v15, %v2489_v47  ;;  %v1059_v50 = vmul.f32 %v2269_v30, %v1035_v29  ;;  %v993_v37 = vmul.f32 %v2273_v26, %v2265_v12  ;;  %v2981_v29 = vld [vmem:[#allocation33_spill] sm:$0xff] }
 0x51a   : > { %v1466_v62 = vadd.f32 %v1458_v41, %v1402_v53  ;;  %v2635_v51 = vrot.slane %v1812_v52, %v2980_v56  ;;  %v1098_v47 = vmul.f32 %v1093_v49, %v1980_v43  ;;  %v1099_v58 = vmul.f32 %v1089_v57, %v1982_v44  ;;  %v2982_v57 = vld [vmem:[#allocation2_spill] sm:$0xff] }
 0x51b   : > { %v1202_v53 = vadd.f32 %v1194_v60, %v1129_v61  ;;  %v1058_v41 = vmul.f32 %v2269_v30, %v1034_v11  ;;  %v994_v30 = vmul.f32 %v2273_v26, %v2338_v38  ;;  %v1322_v35 = vmul.f32 %v2382_v32, %v1298_v45 }
 0x51c   : > { %v2616_v27 = vadd.f32 %v1531_v18, %v1466_v62  ;;  %v1485_v36 = vpop.permute.xlu0 %1484  ;;  %v1147_v23 = vpop.permute.xlu1 %1146  ;;  %v1371_v18 = vmul.f32 %v2635_v51, %v1358_v4  ;;  %v1430_v2 = vsel %vm456_vm4, %v1419_v10, %v2483_v20  ;;  %v1122_v62 = vmul.f32 %v2286_v31, %v1098_v47  ;;  %v2984_v47 = vld [vmem:[#allocation14_spill] sm:$0xff] }
 0x51d   : > { %v1154_v54 = vsel %vm1152_vm14, %v2494_v34, %v1147_v23  ;;  %v1158_v19 = vsel %vm1152_vm14, %v1147_v23, %v2494_v34  ;;  %v1266_v33 = vadd.f32 %v1258_v7, %v1202_v53  ;;  %v1123_v16 = vmul.f32 %v2286_v31, %v1099_v58  ;;  %v2983_v7 = vld [vmem:[#allocation3_spill] sm:$0xff] }
 0x51e   : > { %v1171_v5 = vmul.f32 %v2513_v8, %v1158_v19  ;;  %v1172_v52 = vmul.f32 %v2580_v55, %v1154_v54  ;;  %v1067_v60 = vadd.f32 %v1059_v50, %v994_v30  ;;  %v1395_v61 = vmul.f32 %v2402_v22, %v1371_v18  ;;  %v2705_v18 = vld [vmem:[%s2899_s2 + $0x18] ss:$0 sm:$0xff] }
 0x51f   : > { %v1330_v10 = vadd.f32 %v1322_v35, %v1266_v33  ;;  %v1435_v45 = vmul.f32 %v1430_v2, %v2983_v7  ;;  %v1496_v56 = vsel %vm1490_vm0, %v1485_v36, %v2601_v59  ;;  %v1495_v30 = vsel %vm1490_vm0, %v2479_v21, %v2473_v40  ;;  %v2988_v40 = vld [vmem:[#allocation35_spill] sm:$0xff] }
 0x520   : > { %v2644_v15 = vpop.permute.xlu0 %1478  ;;  %v1220_v34 = vpop.permute.xlu1 %1219  ;;  %v1195_v32 = vmul.f32 %v2330_v9, %v1171_v5  ;;  %v1196_v11 = vmul.f32 %v2330_v9, %v1172_v52  ;;  %v1131_v19 = vadd.f32 %v1123_v16, %v1067_v60  ;;  %v1492_v9 = vsel %vm1490_vm0, %v2601_v59, %v1485_v36  ;;  %v2987_v16 = vld [vmem:[#allocation22_spill] sm:$0xff] }
 0x521   : > { %v1226_v0 = vsel %vm399_vm1, %v2508_v39, %v1220_v34  ;;  %v1230_v42 = vsel %vm399_vm1, %v1220_v34, %v2508_v39  ;;  %v1066_v39 = vadd.f32 %v1058_v41, %v993_v37  ;;  %v2985_v34 = vld [vmem:[#allocation34_spill] sm:$0xff]  ;;  %v1403_v33 = vadd.f32 %v1395_v61, %v1330_v10 }
 0x522   : > { %v1235_v12 = vmul.f32 %v1230_v42, %v1950_v13  ;;  %v1236_v46 = vmul.f32 %v1226_v0, %v1952_v14  ;;  %v1204_v22 = vadd.f32 %v1196_v11, %v1131_v19  ;;  %v2986_v0 = vld [vmem:[#allocation19_spill] sm:$0xff]  ;;  %v1459_v35 = vmul.f32 %v2422_v25, %v1435_v45  ;;  %v2989_v45 = vld [vmem:[#allocation25_spill] sm:$0xff] }
 0x523   : > { %v1130_v54 = vadd.f32 %v1122_v62, %v1066_v39  ;;  %v1510_v21 = vmul.f32 %v2705_v18, %v1496_v56  ;;  %v1508_v10 = vmul.f32 %v2705_v18, %v1495_v30 }
 0x524   : > { %v1012_v26 = vpop.permute.xlu0 %1011  ;;  %v1284_v38 = vpop.permute.xlu1 %1283  ;;  %v1259_v58 = vmul.f32 %v2984_v47, %v1235_v12  ;;  %v1260_v53 = vmul.f32 %v2984_v47, %v1236_v46  ;;  %v2990_v47 = vld [vmem:[#allocation28_spill] sm:$0xff] }
 0x525   : > { %v1290_v20 = vsel %vm418_vm2, %v2981_v29, %v1284_v38  ;;  %v1294_v31 = vsel %vm418_vm2, %v1284_v38, %v2981_v29  ;;  %v1203_v50 = vadd.f32 %v1195_v32, %v1130_v54  ;;  %v1509_v38 = vmul.f32 %v2573_v28, %v1492_v9 }
 0x526   : > { %v1299_v49 = vmul.f32 %v1290_v20, %v2982_v57  ;;  %v1300_v23 = vmul.f32 %v1294_v31, %v1957_v17  ;;  %v1268_v62 = vadd.f32 %v1260_v53, %v1204_v22  ;;  %v1534_v53 = vmul.f32 %v2990_v47, %v1510_v21 }
 0x527   : > { %v1267_v2 = vadd.f32 %v1259_v58, %v1203_v50  ;;  %v1533_v58 = vmul.f32 %v2990_v47, %v1509_v38 }
 0x528   : > { %v1085_v4 = vpop.permute.xlu0 %1084  ;;  %v1348_v41 = vpop.permute.xlu1 %1347  ;;  %v1323_v42 = vmul.f32 %v2986_v0, %v1299_v49  ;;  %v1324_v59 = vmul.f32 %v2986_v0, %v1300_v23  ;;  %v1467_v49 = vadd.f32 %v1459_v35, %v1403_v33  ;;  %v1532_v0 = vmul.f32 %v2443_v24, %v1508_v10 }
 0x529   : > { %v1355_v5 = vsel %vm1353_vm15, %v2985_v34, %v1348_v41  ;;  %v1359_v52 = vsel %vm1353_vm15, %v1348_v41, %v2985_v34 }
 0x52a   : > { %v1372_v36 = vmul.f32 %v2547_v1, %v1355_v5  ;;  %v1373_v37 = vmul.f32 %v2635_v51, %v1359_v52  ;;  %v1331_v11 = vadd.f32 %v1323_v42, %v1267_v2  ;;  %v1332_v29 = vadd.f32 %v1324_v59, %v1268_v62  ;;  %v2991_v59 = vld [vmem:[#allocation31_spill] sm:$0xff] }
 0x52b   : > { %v1540_v62 = vadd.f32 %v1532_v0, %v1467_v49 }
 0x52c   : > { %v1396_v39 = vmul.f32 %v2987_v16, %v1372_v36  ;;  %v1397_v60 = vmul.f32 %v2987_v16, %v1373_v37  ;;  %v1149_v12 = vpop.permute.xlu0 %1148  ;;  %v1421_v46 = vpop.permute.xlu1 %1420  ;;  %v2992_v16 = vld [vmem:[#allocation15_spill] sm:$0xff] }
 0x52d   : > { %v1427_v25 = vsel %vm456_vm4, %v2988_v40, %v1421_v46  ;;  %v1431_v32 = vsel %vm456_vm4, %v1421_v46, %v2988_v40  ;;  %v2994_v46 = vld [vmem:[#allocation18_spill] sm:$0xff] }
 0x52e   : > { %v1436_v20 = vmul.f32 %v1427_v25, %v1989_v48  ;;  %v1437_v31 = vmul.f32 %v1431_v32, %v2983_v7  ;;  %v1404_v23 = vadd.f32 %v1396_v39, %v1331_v11  ;;  %v1405_v61 = vadd.f32 %v1397_v60, %v1332_v29  ;;  %v2993_v39 = vld [vmem:[#allocation9_spill] sm:$0xff]  ;;  %v2995_v29 = vld [vmem:[#allocation11_spill] sm:$0xff] }
 0x52f   : > { %v995_v60 = vmul.f32 %v2993_v39, %v2992_v16  ;;  %v996_v24 = vmul.f32 %v2993_v39, %v2994_v46 }
 0x530   : > { %v1460_v54 = vmul.f32 %v2989_v45, %v1436_v20  ;;  %v1461_v19 = vmul.f32 %v2989_v45, %v1437_v31  ;;  %v1222_v9 = vpop.permute.xlu0 %1221  ;;  %v1004_v56 = vpop.permute.xlu1 %1003 }
 0x531   : > { %v1018_v41 = vsel %vm1015_vm13, %v1004_v56, %v1012_v26  ;;  %v1022_v50 = vsel %vm1015_vm13, %v1012_v26, %v1004_v56 }
 0x532   : > { %v1468_v22 = vadd.f32 %v1460_v54, %v1404_v23  ;;  %v1469_v34 = vadd.f32 %v1461_v19, %v1405_v61  ;;  %v1036_v5 = vmul.f32 %v2500_v63, %v1022_v50  ;;  %v1037_v52 = vmul.f32 %v2553_v3, %v1018_v41  ;;  %v2996_v19 = vld [vmem:[#allocation13_spill] sm:$0xff] }
 0x534   : > { %v1541_v42 = vadd.f32 %v1533_v58, %v1468_v22  ;;  %v1060_v36 = vmul.f32 %v2991_v59, %v1036_v5  ;;  %v1061_v37 = vmul.f32 %v2991_v59, %v1037_v52  ;;  %v1286_v30 = vpop.permute.xlu0 %1285  ;;  %v1077_v33 = vpop.permute.xlu1 %1076  ;;  %v1542_v35 = vadd.f32 %v1534_v53, %v1469_v34  ;;  %v2997_v52 = vld [vmem:[#allocation17_spill] sm:$0xff] }
 0x535   : > { %v1090_v2 = vsel %vm437_vm3, %v1077_v33, %v1085_v4  ;;  %v1094_v26 = vsel %vm437_vm3, %v1085_v4, %v1077_v33 }
 0x536   : > { %v1100_v38 = vmul.f32 %v1094_v26, %v1980_v43  ;;  %v1101_v21 = vmul.f32 %v1090_v2, %v1982_v44  ;;  %v1709_v40 = vpack.c.bf16 %v1542_v35, %v1540_v62  ;;  %v1711_v25 = vpack.c.bf16 %v1541_v42, %v2616_v27 }
 0x537   : > { %v1068_v32 = vadd.f32 %v1060_v36, %v995_v60  ;;  %v1069_v11 = vadd.f32 %v1061_v37, %v996_v24 }
 0x538   : > { %v1124_v20 = vmul.f32 %v2995_v29, %v1100_v38  ;;  %v1125_v4 = vmul.f32 %v2995_v29, %v1101_v21  ;;  %v2746_v31 = vpop.permute.xlu0 %1422  ;;  %v1141_v10 = vpop.permute.xlu1 %1140  ;;  %1710 = vmatprep.subr.bf16.mxu0 %v1709_v40  ;;  %v2998_v38 = vld [vmem:[#allocation21_spill] sm:$0xff] }
 0x539   : > { %v1155_v49 = vsel %vm1152_vm14, %v1141_v10, %v1149_v12  ;;  %v1159_v23 = vsel %vm1152_vm14, %v1149_v12, %v1141_v10  ;;  %1712 = vmatpush1.bf16.msra.mxu0 %v1711_v25  ;;  %v2999_v10 = vld [vmem:[#allocation24_spill] sm:$0xff] }
 0x53a   : > { %v1132_v61 = vadd.f32 %v1124_v20, %v1068_v32  ;;  %v1133_v45 = vadd.f32 %v1125_v4, %v1069_v11  ;;  %v1173_v27 = vmul.f32 %v2513_v8, %v1159_v23  ;;  %v1174_v54 = vmul.f32 %v2580_v55, %v1155_v49 }
 0x53c   : > { %v1197_v56 = vmul.f32 %v2996_v19, %v1173_v27  ;;  %v1198_v47 = vmul.f32 %v2996_v19, %v1174_v54  ;;  %v1344_v58 = vpop.permute.xlu0 %1343  ;;  %v1214_v53 = vpop.permute.xlu1 %1213 }
 0x53d   : > { %v1227_v41 = vsel %vm399_vm1, %v1214_v53, %v1222_v9  ;;  %v1231_v50 = vsel %vm399_vm1, %v1222_v9, %v1214_v53 }
 0x53e   : > { %v1205_v12 = vadd.f32 %v1197_v56, %v1132_v61  ;;  %v1206_v22 = vadd.f32 %v1198_v47, %v1133_v45  ;;  %v1237_v34 = vmul.f32 %v1231_v50, %v1950_v13  ;;  %v1238_v5 = vmul.f32 %v1227_v41, %v1952_v14 }
 0x540   : > { %v1261_v0 = vmul.f32 %v2997_v52, %v1237_v34  ;;  %v1262_v42 = vmul.f32 %v2997_v52, %v1238_v5  ;;  %v1352_v59 = vpop.permute.xlu0 %1351  ;;  %v1278_v36 = vpop.permute.xlu1 %1277 }
 0x541   : > { %v1357_v37 = vsel %vm1353_vm15, %v1344_v58, %v1352_v59  ;;  %v1361_v33 = vsel %vm1353_vm15, %v1352_v59, %v1344_v58  ;;  %v1291_v16 = vsel %vm418_vm2, %v1278_v36, %v1286_v30  ;;  %v1295_v39 = vsel %vm418_vm2, %v1286_v30, %v1278_v36  ;;  %v3000_v59 = vld [vmem:[#allocation10_spill] sm:$0xff] }
 0x542   : > { %v1269_v35 = vadd.f32 %v1261_v0, %v1205_v12  ;;  %v1270_v9 = vadd.f32 %v1262_v42, %v1206_v22  ;;  %v2769_v2 = vmul.f32 %v2547_v1, %v1357_v37  ;;  %v2772_v26 = vmul.f32 %v2635_v51, %v1361_v33 }
 0x543   : > { %v1301_v60 = vmul.f32 %v1291_v16, %v2982_v57  ;;  %v1302_v46 = vmul.f32 %v1295_v39, %v1957_v17  ;;  %v3003_v16 = vld [vmem:[#allocation8_spill] sm:$0xff] }
 0x544   : > { %v1342_v62 = vpop.permute.xlu1 %1341  ;;  %v3004_v39 = vld [vmem:[#allocation12_spill] sm:$0xff] }
 0x545   : > { %v1325_v21 = vmul.f32 %v2998_v38, %v1301_v60  ;;  %v1326_v40 = vmul.f32 %v2998_v38, %v1302_v46 }
 0x547   : > { %v1333_v20 = vadd.f32 %v1325_v21, %v1269_v35  ;;  %v1334_v4 = vadd.f32 %v1326_v40, %v1270_v9  ;;  %v3001_v9 = vld [vmem:[#allocation6_spill] sm:$0xff] }
 0x548   : > { %v1415_v24 = vpop.permute.xlu1 %1414 }
 0x54c   : > { %v1350_v25 = vpop.permute.xlu1 %1349 }
 0x54d   : > { %v1356_v32 = vsel %vm1353_vm15, %v1342_v62, %v1350_v25  ;;  %v1360_v11 = vsel %vm1353_vm15, %v1350_v25, %v1342_v62  ;;  %v3002_v62 = vld [vmem:[#allocation7_spill] sm:$0xff] }
 0x54e   : > { %v1374_v29 = vmul.f32 %v2547_v1, %v1356_v32  ;;  %v1375_v30 = vmul.f32 %v2635_v51, %v1360_v11 }
 0x550   : > { %v1398_v49 = vmul.f32 %v2999_v10, %v1374_v29  ;;  %v1399_v23 = vmul.f32 %v2999_v10, %v1375_v30  ;;  %v1006_v61 = vpop.permute.xlu1 %1005  ;;  %v1487_v10 = vpop.permute.xlu0 %1486 }
 0x552   : > { %v2790_v45 = vadd.f32 %v1398_v49, %v1333_v20  ;;  %v2792_v27 = vadd.f32 %v1399_v23, %v1334_v4  ;;  %v1428_v20 = vsel %vm456_vm4, %v1415_v24, %v2746_v31  ;;  %v1432_v4 = vsel %vm456_vm4, %v2746_v31, %v1415_v24 }
 0x553   : > { %v1493_v24 = vsel %vm1490_vm0, %v2644_v15, %v1487_v10 }
 0x554   : > { %v1079_v54 = vpop.permute.xlu1 %1078 }
 0x558   : > { %v1143_v19 = vpop.permute.xlu1 %1142 }
 0x55c   : > { %v1216_v56 = vpop.permute.xlu1 %1215 }
 0x560   : > { %v1280_v47 = vpop.permute.xlu1 %1279 }
 0x564   : > { %v1417_v58 = vpop.permute.xlu1 %1416 }
 0x568   : > { %v2794_v53 = vpop.permute.xlu1 %1480 }
 0x56c   : > { %v1014_v1 = vpop.permute.xlu1 %1013 }
 0x56d   : > { %v1019_v51 = vsel %vm1015_vm13, %v1006_v61, %v1014_v1  ;;  %v1023_v41 = vsel %vm1015_vm13, %v1014_v1, %v1006_v61  ;;  %v3006_v61 = vld [vmem:[#allocation20_spill] sm:$0xff] }
 0x56e   : > { %v1038_v12 = vmul.f32 %v2500_v63, %v1023_v41  ;;  %v1039_v22 = vmul.f32 %v2553_v3, %v1019_v51 }
 0x570   : > { %v1087_v50 = vpop.permute.xlu1 %1086  ;;  %v1062_v36 = vmul.f32 %v3000_v59, %v1038_v12  ;;  %v1063_v37 = vmul.f32 %v3000_v59, %v1039_v22  ;;  %v1438_v12 = vmul.f32 %v1428_v20, %v1989_v48  ;;  %v1439_v22 = vmul.f32 %v1432_v4, %v2983_v7 }
 0x571   : > { %v1091_v34 = vsel %vm437_vm3, %v1079_v54, %v1087_v50  ;;  %v1095_v5 = vsel %vm437_vm3, %v1087_v50, %v1079_v54  ;;  %v1497_v50 = vsel %vm1490_vm0, %v1487_v10, %v2644_v15 }
 0x572   : > { %v1102_v52 = vmul.f32 %v1095_v5, %v1980_v43  ;;  %v1103_v0 = vmul.f32 %v1091_v34, %v1982_v44  ;;  %v997_v43 = vmul.f32 %v3002_v62, %v3001_v9  ;;  %v998_v44 = vmul.f32 %v3002_v62, %v3003_v16  ;;  %v3007_v5 = vld [vmem:[#allocation23_spill] sm:$0xff] }
 0x573   : > { %v1512_v9 = vmul.f32 %v2705_v18, %v1497_v50 }
 0x574   : > { %v1151_v42 = vpop.permute.xlu1 %1150  ;;  %v1126_v60 = vmul.f32 %v3004_v39, %v1102_v52  ;;  %v1127_v46 = vmul.f32 %v3004_v39, %v1103_v0  ;;  %v1070_v21 = vadd.f32 %v1062_v36, %v997_v43  ;;  %v1071_v40 = vadd.f32 %v1063_v37, %v998_v44  ;;  %v3010_v44 = vld [vmem:[#allocation29_spill] sm:$0xff] }
 0x575   : > { %v1156_v63 = vsel %vm1152_vm14, %v1143_v19, %v1151_v42  ;;  %v1160_v3 = vsel %vm1152_vm14, %v1151_v42, %v1143_v19 }
 0x576   : > { %v1175_v33 = vmul.f32 %v2513_v8, %v1160_v3  ;;  %v1176_v35 = vmul.f32 %v2580_v55, %v1156_v63  ;;  %v3005_v55 = vld [vmem:[#allocation16_spill] sm:$0xff]  ;;  %v1134_v49 = vadd.f32 %v1126_v60, %v1070_v21  ;;  %v1135_v23 = vadd.f32 %v1127_v46, %v1071_v40 }
 0x578   : > { %v1224_v38 = vpop.permute.xlu1 %1223  ;;  %v1199_v32 = vmul.f32 %v3005_v55, %v1175_v33  ;;  %v1200_v11 = vmul.f32 %v3005_v55, %v1176_v35  ;;  %v1511_v35 = vmul.f32 %v2573_v28, %v1493_v24 }
 0x579   : > { %v1228_v25 = vsel %vm399_vm1, %v1216_v56, %v1224_v38  ;;  %v1232_v8 = vsel %vm399_vm1, %v1224_v38, %v1216_v56  ;;  %vm1554_vm1 = vcmask 261120  }
 0x57a   : > { %v1239_v29 = vmul.f32 %v1232_v8, %v1950_v13  ;;  %v1240_v30 = vmul.f32 %v1228_v25, %v1952_v14  ;;  %v1207_v1 = vadd.f32 %v1199_v32, %v1134_v49  ;;  %v1208_v51 = vadd.f32 %v1200_v11, %v1135_v23  ;;  %v3011_v25 = vld [vmem:[#allocation32_spill] sm:$0xff] }
 0x57b   : > { %v1535_v8 = vmul.f32 %v3011_v25, %v1511_v35  ;;  %v1536_v55 = vmul.f32 %v3011_v25, %v1512_v9 }
 0x57c   : > { %v1263_v54 = vmul.f32 %v3006_v61, %v1239_v29  ;;  %v1264_v19 = vmul.f32 %v3006_v61, %v1240_v30  ;;  %v1288_v56 = vpop.permute.xlu1 %1287  ;;  %v3012_v29 = vld [vmem:[#allocation30_spill] sm:$0xff] }
 0x57d   : > { %v1292_v13 = vsel %vm418_vm2, %v1280_v47, %v1288_v56  ;;  %v1296_v14 = vsel %vm418_vm2, %v1288_v56, %v1280_v47 }
 0x57e   : > { %v1303_v41 = vmul.f32 %v1292_v13, %v2982_v57  ;;  %v1304_v31 = vmul.f32 %v1296_v14, %v1957_v17  ;;  %v1271_v34 = vadd.f32 %v1263_v54, %v1207_v1  ;;  %v1272_v47 = vadd.f32 %v1264_v19, %v1208_v51  ;;  %v3008_v17 = vld [vmem:[#allocation26_spill] sm:$0xff]  ;;  %v3013_v19 = vld [vmem:[#allocation4_spill] sm:$0xff]  ;;  %v3014_v13 = vld [vmem:[#allocation5_spill] sm:$0xff] }
 0x57f   : > { %v1400_v42 = vmul.f32 %v3008_v17, %v2769_v2  ;;  %v1401_v59 = vmul.f32 %v3008_v17, %v2772_v26  ;;  %v3009_v2 = vld [vmem:[#allocation27_spill] sm:$0xff] }
 0x580   : > { %v1327_v52 = vmul.f32 %v3007_v5, %v1303_v41  ;;  %v1328_v57 = vmul.f32 %v3007_v5, %v1304_v31  ;;  %v1425_v0 = vpop.permute.xlu1 %1424  ;;  %v1462_v62 = vmul.f32 %v3009_v2, %v1438_v12  ;;  %v1463_v26 = vmul.f32 %v3009_v2, %v1439_v22 }
 0x581   : > { %v1429_v15 = vsel %vm456_vm4, %v1417_v58, %v1425_v0  ;;  %v1433_v36 = vsel %vm456_vm4, %v1425_v0, %v1417_v58 }
 0x582   : > { %v1335_v37 = vadd.f32 %v1327_v52, %v1271_v34  ;;  %v1336_v63 = vadd.f32 %v1328_v57, %v1272_v47  ;;  %v1440_v3 = vmul.f32 %v1429_v15, %v1989_v48  ;;  %v1441_v33 = vmul.f32 %v1433_v36, %v2983_v7 }
 0x583   : > { %v1470_v46 = vadd.f32 %v1462_v62, %v2790_v45  ;;  %v1471_v40 = vadd.f32 %v1463_v26, %v2792_v27  ;;  %v1552_v27 = vpop.permute.xlu0 %1551 }
 0x584   : > { %v1408_v43 = vadd.f32 %v1400_v42, %v1335_v37  ;;  %v1409_v16 = vadd.f32 %v1401_v59, %v1336_v63  ;;  %v1464_v39 = vmul.f32 %v3010_v44, %v1440_v3  ;;  %v1465_v58 = vmul.f32 %v3010_v44, %v1441_v33  ;;  %v1489_v60 = vpop.permute.xlu1 %1488 }
 0x585   : > { %v1494_v48 = vsel %vm1490_vm0, %v2794_v53, %v1489_v60  ;;  %v1498_v7 = vsel %vm1490_vm0, %v1489_v60, %v2794_v53  ;;  %v1544_v53 = vadd.f32 %v1536_v55, %v1471_v40  ;;  %v1543_v4 = vadd.f32 %v1535_v8, %v1470_v46 }
 0x586   : > { %v1513_v38 = vmul.f32 %v2573_v28, %v1494_v48  ;;  %v1514_v21 = vmul.f32 %v2705_v18, %v1498_v7  ;;  %v1472_v32 = vadd.f32 %v1464_v39, %v1408_v43  ;;  %v1473_v11 = vadd.f32 %v1465_v58, %v1409_v16  ;;  %v1547_v18 = vld [vmem:[%s2906_s9] sm:$0xff] }
 0x588   : > { %v1537_v30 = vmul.f32 %v3012_v29, %v1513_v38  ;;  %v1538_v20 = vmul.f32 %v3012_v29, %v1514_v21 }
 0x58a   : > { %v1545_v6 = vadd.f32 %v1537_v30, %v1472_v32  ;;  %v1546_v45 = vadd.f32 %v1538_v20, %v1473_v11 }
 0x58c   : > { %v1713_v28 = vpack.c.bf16 %v1546_v45, %v1544_v53  ;;  %v1715_v10 = vpack.c.bf16 %v1545_v6, %v1543_v4 }
 0x58e   : > { %1714 = vmatprep.subr.bf16.mxu0 %v1713_v28 }
 0x58f   : > { %1716 = vmatpush1.bf16.msra.mxu0 %v1715_v10 }
 0x592   : > { %1704 = vmatmul.mubr.msk.f32.vlgmr.msra.gmra.mrb[2].mxu0 %vm1554_vm1, %v1547_v18 }
 0x665   : > { %v1624_v49 = vpop.f32.mrb[2].mxu0 }
 0x666   : > { %v1625_v23 = vadd.f32 %v1624_v49, %v1552_v27  ;;  %v1626_v61 = vpop.f32.mrb[3].mxu0 }
 0x667   : > { %v1627_v54 = vadd.f32 %v1626_v61, %v1552_v27 }
 0x668   : > { %v1629_v56 = vadd.f32 %v1625_v23, %v3013_v19 }
 0x669   : > { %v1630_v14 = vadd.f32 %v1627_v54, %v3014_v13 }
 0x66a   : > { %1631 = vst [vmem:[%s386_s27] sm:$0xff] %v1629_v56 }
 0x66b   : > { %1632 = vst [vmem:[%s386_s27 + $0x8] sm:$0xff] %v1630_v14 }
 0x66c PF: > { %s21_s17 = sadd.s32 1, %s1819_s17  }
 0x66d   : > { %p18_p4 = scmp.ge.s32.totalorder %s21_s17, 4  }
 0x66f   :  { %20 = sbr.rel (!%p18_p4) target bundleno = 1 (0x1), region = 94 }

</bundles_post_ra>
